<compile_context>
chip_gen: v5e
topology: v5e:2x2
jax: 0.10.0
libtpu: 0.0.40
codegen_flags: <defaults>
</compile_context>

<pallas_src>
import jax
import jax.numpy as jnp
from jax.experimental import pallas as pl
from jax.experimental.pallas import tpu as pltpu  # noqa: F401  (TPU backend)


# ----------------------------------------------------------------------------
# Pallas kernels
# ----------------------------------------------------------------------------
def _conv_pool_kernel(pat_ref, w_ref, b_ref, o_ref):
    """Fused conv (as matmul) + bias + ReLU + 2x2 max-pool.

    pat_ref: (4, M, K)  im2col patches, one slab per pool tap (t = 2*di + dj),
             M = B*PH*PW pooled positions, K = KH*KW*Cin.
    w_ref:   (K, OC)    conv weight, feature order (kh, kw, cin).
    b_ref:   (1, OC)    bias.
    o_ref:   (M, OC)    pooled, activated output.
    """
    w = w_ref[...]
    b = b_ref[...]

    def tap(t):
        acc = jnp.dot(pat_ref[t], w, preferred_element_type=jnp.float32) + b
        return jnp.maximum(acc, 0.0)

    o_ref[...] = jnp.maximum(
        jnp.maximum(tap(0), tap(1)), jnp.maximum(tap(2), tap(3))
    ).astype(o_ref.dtype)


def _mlp_kernel(x_ref, w1_ref, b1_ref, w2_ref, b2_ref, w3_ref, b3_ref, o_ref):
    """Fused fc1 -> ReLU -> fc2 -> ReLU -> fc3; whole stack resident in VMEM."""
    h = jnp.dot(x_ref[...], w1_ref[...], preferred_element_type=jnp.float32)
    h = jnp.maximum(h + b1_ref[...], 0.0)
    h = jnp.dot(h, w2_ref[...], preferred_element_type=jnp.float32)
    h = jnp.maximum(h + b2_ref[...], 0.0)
    o = jnp.dot(h, w3_ref[...], preferred_element_type=jnp.float32) + b3_ref[...]
    o_ref[...] = o.astype(o_ref.dtype)


def _full_spec(shape):
    """Full-array block (no grid); unpadded shapes are legal as full blocks."""
    ndim = len(shape)
    return pl.BlockSpec(shape, lambda: (0,) * ndim)


# ----------------------------------------------------------------------------
# Wrappers (glue below is layout-only; all FLOPs run inside the kernels)
# ----------------------------------------------------------------------------
def _pool_tap_patches(x, kh, kw):
    """im2col patches grouped by 2x2 pool tap.

    x: (B, H, W, C) NHWC.  Returns pat of shape (4, B*PH*PW, kh*kw*C) with
      pat[2*di+dj, b*PH*PW + p*PW + q, (i*kw + j)*C + c]
        = x[b, 2*p + di + i, 2*q + dj + j, c]
    so every conv-output position appears exactly once (no extra blow-up vs
    plain im2col), arranged so the pool is a 4-way max inside the kernel.
    """
    B, H, W, C = x.shape
    OH, OW = H - kh + 1, W - kw + 1
    PH, PW = OH // 2, OW // 2
    cols = [x[:, i:i + OH, j:j + OW, :] for i in range(kh) for j in range(kw)]
    p = jnp.concatenate(cols, axis=-1)                      # (B, OH, OW, K)
    taps = [p[:, di:di + 2 * PH:2, dj:dj + 2 * PW:2, :]
            for di in (0, 1) for dj in (0, 1)]              # 4 x (B, PH, PW, K)
    pat = jnp.stack(taps, axis=0).reshape(4, B * PH * PW, kh * kw * C)
    return pat, (B, PH, PW)


def conv_relu_pool(x, w, b):
    """Conv2d(valid, stride 1) + bias + ReLU + MaxPool(2,2) in ONE pallas_call.

    x: (B, H, W, C) NHWC; w: PyTorch layout (OC, IC, KH, KW); b: (OC,).
    Returns (B, PH, PW, OC) NHWC.
    """
    OC, IC, KH, KW = w.shape
    pat, (B, PH, PW) = _pool_tap_patches(x, KH, KW)         # (4, M, K)
    M, K = pat.shape[1], pat.shape[2]
    # Reorder weight to (KH, KW, IC, OC) to match the (i, j, c) patch order.
    w2 = jnp.transpose(w, (2, 3, 1, 0)).reshape(K, OC)
    b2 = b.reshape(1, OC)

    out = pl.pallas_call(
        _conv_pool_kernel,
        out_shape=jax.ShapeDtypeStruct((M, OC), jnp.float32),
        in_specs=[_full_spec((4, M, K)),
                  _full_spec((K, OC)),
                  _full_spec((1, OC))],
        out_specs=_full_spec((M, OC)),
    )(pat, w2, b2)
    return out.reshape(B, PH, PW, OC)


def mlp_fused(x, params):
    """fc1 + ReLU, fc2 + ReLU, fc3 in a single pallas_call."""
    B = x.shape[0]
    N_out = params["fc3_w"].shape[1]
    args = (x,
            params["fc1_w"], params["fc1_b"].reshape(1, -1),
            params["fc2_w"], params["fc2_b"].reshape(1, -1),
            params["fc3_w"], params["fc3_b"].reshape(1, -1))
    return pl.pallas_call(
        _mlp_kernel,
        out_shape=jax.ShapeDtypeStruct((B, N_out), jnp.float32),
        in_specs=[_full_spec(a.shape) for a in args],
        out_specs=_full_spec((B, N_out)),
    )(*args)


# ----------------------------------------------------------------------------
# CNNNet forward
# ----------------------------------------------------------------------------
def cnn_net_forward(x_nchw, params):
    x = jnp.transpose(x_nchw, (0, 2, 3, 1))                          # NCHW -> NHWC

    # body: conv1 + ReLU + pool, conv2 + ReLU + pool (one fused kernel each)
    x = conv_relu_pool(x, params["conv1_w"], params["conv1_b"])      # (B,14,14,6)
    x = conv_relu_pool(x, params["conv2_w"], params["conv2_b"])      # (B,5,5,16)

    B = x.shape[0]
    # PyTorch flattens NCHW (B,16,5,5) -> (B,400): go back to NCHW order first.
    x = jnp.transpose(x, (0, 3, 1, 2)).reshape(B, 16 * 5 * 5)

    # fc1+ReLU -> fc2+ReLU -> fc3 (one fused kernel)
    return mlp_fused(x, params)


def init_params(key):
    """Deterministic init mimicking torch's U(-1/sqrt(fan_in), 1/sqrt(fan_in))."""
    ks = jax.random.split(key, 10)

    def u(k, shape, fan_in):
        bound = 1.0 / (fan_in ** 0.5)
        return jax.random.uniform(k, shape, jnp.float32, -bound, bound)

    return {
        "conv1_w": u(ks[0], (6, 3, 5, 5), 3 * 5 * 5),
        "conv1_b": u(ks[1], (6,), 3 * 5 * 5),
        "conv2_w": u(ks[2], (16, 6, 5, 5), 6 * 5 * 5),
        "conv2_b": u(ks[3], (16,), 6 * 5 * 5),
        "fc1_w": u(ks[4], (400, 120), 400),
        "fc1_b": u(ks[5], (120,), 400),
        "fc2_w": u(ks[6], (120, 84), 120),
        "fc2_b": u(ks[7], (84,), 120),
        "fc3_w": u(ks[8], (84, 10), 84),
        "fc3_b": u(ks[9], (10,), 84),
    }


if __name__ == "__main__":
    key = jax.random.PRNGKey(0)
    k_x, k_p = jax.random.split(key)
    # Input must be 32x32 spatial so the flatten hits 16*5*5=400 (CIFAR-style).
    x = jax.random.normal(k_x, (2, 3, 32, 32), dtype=jnp.float32)
    params = init_params(k_p)

    out = jax.jit(cnn_net_forward)(x, params)
    out = jax.block_until_ready(out)
    assert out.shape == (2, 10) and out.dtype == jnp.float32
    print("KERNEL_OK")
</pallas_src>

<mosaic_0001>
module attributes {stable_mosaic.version = 11 : i64} {
  func.func @_conv_pool_kernel(%arg0: memref<4x392x75xf32, #tpu.memory_space<vmem>>, %arg1: memref<75x6xf32, #tpu.memory_space<vmem>>, %arg2: memref<1x6xf32, #tpu.memory_space<vmem>>, %arg3: memref<392x6xf32, #tpu.memory_space<vmem>>) attributes {dimension_semantics = [], scalar_prefetch = 0 : i64, scratch_operands = 0 : i64, tpu.core_type = #tpu.core_type<tc>} {
    %c0 = arith.constant 0 : index
    %c0_0 = arith.constant 0 : index
    %0 = vector.load %arg1[%c0, %c0_0] : memref<75x6xf32, #tpu.memory_space<vmem>>, vector<75x6xf32>
    %c0_1 = arith.constant 0 : index
    %c0_2 = arith.constant 0 : index
    %1 = vector.load %arg2[%c0_1, %c0_2] : memref<1x6xf32, #tpu.memory_space<vmem>>, vector<1x6xf32>
    %c0_3 = arith.constant 0 : index
    %c0_4 = arith.constant 0 : index
    %c0_5 = arith.constant 0 : index
    %2 = vector.load %arg0[%c0_3, %c0_4, %c0_5] : memref<4x392x75xf32, #tpu.memory_space<vmem>>, vector<1x392x75xf32>
    %3 = vector.shape_cast %2 : vector<1x392x75xf32> to vector<392x75xf32>
    %cst = arith.constant dense<0.000000e+00> : vector<392x6xf32>
    %4 = tpu.matmul %3, %0, %cst {dimension_numbers = #tpu.dot_dimension_numbers<[1], [0], [0], [1], [0, 0, 1, 1], [], []>} : vector<392x75xf32>, vector<75x6xf32>, vector<392x6xf32> -> vector<392x6xf32>
    %5 = vector.broadcast %1 : vector<1x6xf32> to vector<392x6xf32>
    %6 = arith.addf %4, %5 : vector<392x6xf32>
    %cst_6 = arith.constant 0.000000e+00 : f32
    %7 = vector.broadcast %cst_6 : f32 to vector<392x6xf32>
    %8 = arith.maximumf %6, %7 : vector<392x6xf32>
    %c1 = arith.constant 1 : index
    %c0_7 = arith.constant 0 : index
    %c0_8 = arith.constant 0 : index
    %9 = vector.load %arg0[%c1, %c0_7, %c0_8] : memref<4x392x75xf32, #tpu.memory_space<vmem>>, vector<1x392x75xf32>
    %10 = vector.shape_cast %9 : vector<1x392x75xf32> to vector<392x75xf32>
    %cst_9 = arith.constant dense<0.000000e+00> : vector<392x6xf32>
    %11 = tpu.matmul %10, %0, %cst_9 {dimension_numbers = #tpu.dot_dimension_numbers<[1], [0], [0], [1], [0, 0, 1, 1], [], []>} : vector<392x75xf32>, vector<75x6xf32>, vector<392x6xf32> -> vector<392x6xf32>
    %12 = vector.broadcast %1 : vector<1x6xf32> to vector<392x6xf32>
    %13 = arith.addf %11, %12 : vector<392x6xf32>
    %cst_10 = arith.constant 0.000000e+00 : f32
    %14 = vector.broadcast %cst_10 : f32 to vector<392x6xf32>
    %15 = arith.maximumf %13, %14 : vector<392x6xf32>
    %16 = arith.maximumf %8, %15 : vector<392x6xf32>
    %c2 = arith.constant 2 : index
    %c0_11 = arith.constant 0 : index
    %c0_12 = arith.constant 0 : index
    %17 = vector.load %arg0[%c2, %c0_11, %c0_12] : memref<4x392x75xf32, #tpu.memory_space<vmem>>, vector<1x392x75xf32>
    %18 = vector.shape_cast %17 : vector<1x392x75xf32> to vector<392x75xf32>
    %cst_13 = arith.constant dense<0.000000e+00> : vector<392x6xf32>
    %19 = tpu.matmul %18, %0, %cst_13 {dimension_numbers = #tpu.dot_dimension_numbers<[1], [0], [0], [1], [0, 0, 1, 1], [], []>} : vector<392x75xf32>, vector<75x6xf32>, vector<392x6xf32> -> vector<392x6xf32>
    %20 = vector.broadcast %1 : vector<1x6xf32> to vector<392x6xf32>
    %21 = arith.addf %19, %20 : vector<392x6xf32>
    %cst_14 = arith.constant 0.000000e+00 : f32
    %22 = vector.broadcast %cst_14 : f32 to vector<392x6xf32>
    %23 = arith.maximumf %21, %22 : vector<392x6xf32>
    %c3 = arith.constant 3 : index
    %c0_15 = arith.constant 0 : index
    %c0_16 = arith.constant 0 : index
    %24 = vector.load %arg0[%c3, %c0_15, %c0_16] : memref<4x392x75xf32, #tpu.memory_space<vmem>>, vector<1x392x75xf32>
    %25 = vector.shape_cast %24 : vector<1x392x75xf32> to vector<392x75xf32>
    %cst_17 = arith.constant dense<0.000000e+00> : vector<392x6xf32>
    %26 = tpu.matmul %25, %0, %cst_17 {dimension_numbers = #tpu.dot_dimension_numbers<[1], [0], [0], [1], [0, 0, 1, 1], [], []>} : vector<392x75xf32>, vector<75x6xf32>, vector<392x6xf32> -> vector<392x6xf32>
    %27 = vector.broadcast %1 : vector<1x6xf32> to vector<392x6xf32>
    %28 = arith.addf %26, %27 : vector<392x6xf32>
    %cst_18 = arith.constant 0.000000e+00 : f32
    %29 = vector.broadcast %cst_18 : f32 to vector<392x6xf32>
    %30 = arith.maximumf %28, %29 : vector<392x6xf32>
    %31 = arith.maximumf %23, %30 : vector<392x6xf32>
    %32 = arith.maximumf %16, %31 : vector<392x6xf32>
    %c0_19 = arith.constant 0 : index
    %c0_20 = arith.constant 0 : index
    %33 = vector.load %arg3[%c0_19, %c0_20] : memref<392x6xf32, #tpu.memory_space<vmem>>, vector<392x6xf32>
    tpu.vector_store %arg3[%c0_19, %c0_20], %32 {strides = array<i32>} : memref<392x6xf32, #tpu.memory_space<vmem>>, vector<392x6xf32>,
    return
  }
}

module attributes {stable_mosaic.version = 11 : i64} {
  func.func @_conv_pool_kernel(%arg0: memref<4x50x150xf32, #tpu.memory_space<vmem>>, %arg1: memref<150x16xf32, #tpu.memory_space<vmem>>, %arg2: memref<1x16xf32, #tpu.memory_space<vmem>>, %arg3: memref<50x16xf32, #tpu.memory_space<vmem>>) attributes {dimension_semantics = [], scalar_prefetch = 0 : i64, scratch_operands = 0 : i64, tpu.core_type = #tpu.core_type<tc>} {
    %c0 = arith.constant 0 : index
    %c0_0 = arith.constant 0 : index
    %0 = vector.load %arg1[%c0, %c0_0] : memref<150x16xf32, #tpu.memory_space<vmem>>, vector<150x16xf32>
    %c0_1 = arith.constant 0 : index
    %c0_2 = arith.constant 0 : index
    %1 = vector.load %arg2[%c0_1, %c0_2] : memref<1x16xf32, #tpu.memory_space<vmem>>, vector<1x16xf32>
    %c0_3 = arith.constant 0 : index
    %c0_4 = arith.constant 0 : index
    %c0_5 = arith.constant 0 : index
    %2 = vector.load %arg0[%c0_3, %c0_4, %c0_5] : memref<4x50x150xf32, #tpu.memory_space<vmem>>, vector<1x50x150xf32>
    %3 = vector.shape_cast %2 : vector<1x50x150xf32> to vector<50x150xf32>
    %cst = arith.constant dense<0.000000e+00> : vector<50x16xf32>
    %4 = tpu.matmul %3, %0, %cst {dimension_numbers = #tpu.dot_dimension_numbers<[1], [0], [0], [1], [0, 0, 1, 1], [], []>} : vector<50x150xf32>, vector<150x16xf32>, vector<50x16xf32> -> vector<50x16xf32>
    %5 = vector.broadcast %1 : vector<1x16xf32> to vector<50x16xf32>
    %6 = arith.addf %4, %5 : vector<50x16xf32>
    %cst_6 = arith.constant 0.000000e+00 : f32
    %7 = vector.broadcast %cst_6 : f32 to vector<50x16xf32>
    %8 = arith.maximumf %6, %7 : vector<50x16xf32>
    %c1 = arith.constant 1 : index
    %c0_7 = arith.constant 0 : index
    %c0_8 = arith.constant 0 : index
    %9 = vector.load %arg0[%c1, %c0_7, %c0_8] : memref<4x50x150xf32, #tpu.memory_space<vmem>>, vector<1x50x150xf32>
    %10 = vector.shape_cast %9 : vector<1x50x150xf32> to vector<50x150xf32>
    %cst_9 = arith.constant dense<0.000000e+00> : vector<50x16xf32>
    %11 = tpu.matmul %10, %0, %cst_9 {dimension_numbers = #tpu.dot_dimension_numbers<[1], [0], [0], [1], [0, 0, 1, 1], [], []>} : vector<50x150xf32>, vector<150x16xf32>, vector<50x16xf32> -> vector<50x16xf32>
    %12 = vector.broadcast %1 : vector<1x16xf32> to vector<50x16xf32>
    %13 = arith.addf %11, %12 : vector<50x16xf32>
    %cst_10 = arith.constant 0.000000e+00 : f32
    %14 = vector.broadcast %cst_10 : f32 to vector<50x16xf32>
    %15 = arith.maximumf %13, %14 : vector<50x16xf32>
    %16 = arith.maximumf %8, %15 : vector<50x16xf32>
    %c2 = arith.constant 2 : index
    %c0_11 = arith.constant 0 : index
    %c0_12 = arith.constant 0 : index
    %17 = vector.load %arg0[%c2, %c0_11, %c0_12] : memref<4x50x150xf32, #tpu.memory_space<vmem>>, vector<1x50x150xf32>
    %18 = vector.shape_cast %17 : vector<1x50x150xf32> to vector<50x150xf32>
    %cst_13 = arith.constant dense<0.000000e+00> : vector<50x16xf32>
    %19 = tpu.matmul %18, %0, %cst_13 {dimension_numbers = #tpu.dot_dimension_numbers<[1], [0], [0], [1], [0, 0, 1, 1], [], []>} : vector<50x150xf32>, vector<150x16xf32>, vector<50x16xf32> -> vector<50x16xf32>
    %20 = vector.broadcast %1 : vector<1x16xf32> to vector<50x16xf32>
    %21 = arith.addf %19, %20 : vector<50x16xf32>
    %cst_14 = arith.constant 0.000000e+00 : f32
    %22 = vector.broadcast %cst_14 : f32 to vector<50x16xf32>
    %23 = arith.maximumf %21, %22 : vector<50x16xf32>
    %c3 = arith.constant 3 : index
    %c0_15 = arith.constant 0 : index
    %c0_16 = arith.constant 0 : index
    %24 = vector.load %arg0[%c3, %c0_15, %c0_16] : memref<4x50x150xf32, #tpu.memory_space<vmem>>, vector<1x50x150xf32>
    %25 = vector.shape_cast %24 : vector<1x50x150xf32> to vector<50x150xf32>
    %cst_17 = arith.constant dense<0.000000e+00> : vector<50x16xf32>
    %26 = tpu.matmul %25, %0, %cst_17 {dimension_numbers = #tpu.dot_dimension_numbers<[1], [0], [0], [1], [0, 0, 1, 1], [], []>} : vector<50x150xf32>, vector<150x16xf32>, vector<50x16xf32> -> vector<50x16xf32>
    %27 = vector.broadcast %1 : vector<1x16xf32> to vector<50x16xf32>
    %28 = arith.addf %26, %27 : vector<50x16xf32>
    %cst_18 = arith.constant 0.000000e+00 : f32
    %29 = vector.broadcast %cst_18 : f32 to vector<50x16xf32>
    %30 = arith.maximumf %28, %29 : vector<50x16xf32>
    %31 = arith.maximumf %23, %30 : vector<50x16xf32>
    %32 = arith.maximumf %16, %31 : vector<50x16xf32>
    %c0_19 = arith.constant 0 : index
    %c0_20 = arith.constant 0 : index
    %33 = vector.load %arg3[%c0_19, %c0_20] : memref<50x16xf32, #tpu.memory_space<vmem>>, vector<50x16xf32>
    tpu.vector_store %arg3[%c0_19, %c0_20], %32 {strides = array<i32>} : memref<50x16xf32, #tpu.memory_space<vmem>>, vector<50x16xf32>,
    return
  }
}

module attributes {stable_mosaic.version = 11 : i64} {
  func.func @_mlp_kernel(%arg0: memref<2x400xf32, #tpu.memory_space<vmem>>, %arg1: memref<400x120xf32, #tpu.memory_space<vmem>>, %arg2: memref<1x120xf32, #tpu.memory_space<vmem>>, %arg3: memref<120x84xf32, #tpu.memory_space<vmem>>, %arg4: memref<1x84xf32, #tpu.memory_space<vmem>>, %arg5: memref<84x10xf32, #tpu.memory_space<vmem>>, %arg6: memref<1x10xf32, #tpu.memory_space<vmem>>, %arg7: memref<2x10xf32, #tpu.memory_space<vmem>>) attributes {dimension_semantics = [], scalar_prefetch = 0 : i64, scratch_operands = 0 : i64, tpu.core_type = #tpu.core_type<tc>} {
    %c0 = arith.constant 0 : index
    %c0_0 = arith.constant 0 : index
    %0 = vector.load %arg0[%c0, %c0_0] : memref<2x400xf32, #tpu.memory_space<vmem>>, vector<2x400xf32>
    %c0_1 = arith.constant 0 : index
    %c0_2 = arith.constant 0 : index
    %1 = vector.load %arg1[%c0_1, %c0_2] : memref<400x120xf32, #tpu.memory_space<vmem>>, vector<400x120xf32>
    %cst = arith.constant dense<0.000000e+00> : vector<2x120xf32>
    %2 = tpu.matmul %0, %1, %cst {dimension_numbers = #tpu.dot_dimension_numbers<[1], [0], [0], [1], [0, 0, 1, 1], [], []>} : vector<2x400xf32>, vector<400x120xf32>, vector<2x120xf32> -> vector<2x120xf32>
    %c0_3 = arith.constant 0 : index
    %c0_4 = arith.constant 0 : index
    %3 = vector.load %arg2[%c0_3, %c0_4] : memref<1x120xf32, #tpu.memory_space<vmem>>, vector<1x120xf32>
    %4 = vector.broadcast %3 : vector<1x120xf32> to vector<2x120xf32>
    %5 = arith.addf %2, %4 : vector<2x120xf32>
    %cst_5 = arith.constant 0.000000e+00 : f32
    %6 = vector.broadcast %cst_5 : f32 to vector<2x120xf32>
    %7 = arith.maximumf %5, %6 : vector<2x120xf32>
    %c0_6 = arith.constant 0 : index
    %c0_7 = arith.constant 0 : index
    %8 = vector.load %arg3[%c0_6, %c0_7] : memref<120x84xf32, #tpu.memory_space<vmem>>, vector<120x84xf32>
    %cst_8 = arith.constant dense<0.000000e+00> : vector<2x84xf32>
    %9 = tpu.matmul %7, %8, %cst_8 {dimension_numbers = #tpu.dot_dimension_numbers<[1], [0], [0], [1], [0, 0, 1, 1], [], []>} : vector<2x120xf32>, vector<120x84xf32>, vector<2x84xf32> -> vector<2x84xf32>
    %c0_9 = arith.constant 0 : index
    %c0_10 = arith.constant 0 : index
    %10 = vector.load %arg4[%c0_9, %c0_10] : memref<1x84xf32, #tpu.memory_space<vmem>>, vector<1x84xf32>
    %11 = vector.broadcast %10 : vector<1x84xf32> to vector<2x84xf32>
    %12 = arith.addf %9, %11 : vector<2x84xf32>
    %cst_11 = arith.constant 0.000000e+00 : f32
    %13 = vector.broadcast %cst_11 : f32 to vector<2x84xf32>
    %14 = arith.maximumf %12, %13 : vector<2x84xf32>
    %c0_12 = arith.constant 0 : index
    %c0_13 = arith.constant 0 : index
    %15 = vector.load %arg5[%c0_12, %c0_13] : memref<84x10xf32, #tpu.memory_space<vmem>>, vector<84x10xf32>
    %cst_14 = arith.constant dense<0.000000e+00> : vector<2x10xf32>
    %16 = tpu.matmul %14, %15, %cst_14 {dimension_numbers = #tpu.dot_dimension_numbers<[1], [0], [0], [1], [0, 0, 1, 1], [], []>} : vector<2x84xf32>, vector<84x10xf32>, vector<2x10xf32> -> vector<2x10xf32>
    %c0_15 = arith.constant 0 : index
    %c0_16 = arith.constant 0 : index
    %17 = vector.load %arg6[%c0_15, %c0_16] : memref<1x10xf32, #tpu.memory_space<vmem>>, vector<1x10xf32>
    %18 = vector.broadcast %17 : vector<1x10xf32> to vector<2x10xf32>
    %19 = arith.addf %16, %18 : vector<2x10xf32>
    %c0_17 = arith.constant 0 : index
    %c0_18 = arith.constant 0 : index
    %20 = vector.load %arg7[%c0_17, %c0_18] : memref<2x10xf32, #tpu.memory_space<vmem>>, vector<2x10xf32>
    tpu.vector_store %arg7[%c0_17, %c0_18], %19 {strides = array<i32>} : memref<2x10xf32, #tpu.memory_space<vmem>>, vector<2x10xf32>,
    return
  }
}

</mosaic_0001>

<bundles_post_ra>
// kernel: cnn_net_forward.3
= control target key start
LH: loop header
LB: loop body
LE: loop exit
PB: predicated region body
PF: predicated region fallthrough
CT: control target
= control target key end

     0   :  { %vm225_vm0 = vcmask 1042432   ;;  %vm77_vm1 = vcmask 613376   ;;  %vm1819_vm2 = vcmask 48128   ;;  %s3456_s1 = inlined_call_operand.vmem [shape: f32[75,6], index: 1, kind: input, shape index: {}]   ;;  %s3457_s0 = inlined_call_operand.vmem [shape: f32[4,392,75], index: 0, kind: input, shape index: {}]   ;;  %s3458_s2 = inlined_call_operand.vmem [shape: f32[1,6], index: 2, kind: input, shape index: {}]   ;;  %s3459_s3 = inlined_call_operand.vmem [shape: f32[392,6], index: 3, kind: output, shape index: {}]  }
   0x1   :  { %v23_v0 = vld [vmem:[%s3456_s1 + $0x48] sm:$0x7]  ;;  %v22_v1 = vld [vmem:[%s3456_s1 + $0x40] sm:$0xff]  ;;  %v21_v2 = vld [vmem:[%s3456_s1 + $0x38] sm:$0xff] }
   0x2   :  { %2071 = vmatpush.msk.msra.mxu2 %vm225_vm0, %v23_v0  ;;  %2170 = vmatpush.msk.msra.mxu3 %vm225_vm0, %v23_v0  ;;  %v20_v3 = vld [vmem:[%s3456_s1 + $0x30] sm:$0xff]  ;;  %v19_v4 = vld [vmem:[%s3456_s1 + $0x28] sm:$0xff]  ;;  %v18_v5 = vld [vmem:[%s3456_s1 + $0x20] sm:$0xff] }
   0x3   :  { %1873 = vmatpush.msk.msra.mxu0 %vm225_vm0, %v23_v0  ;;  %1972 = vmatpush.msk.msra.mxu1 %vm225_vm0, %v23_v0  ;;  %v17_v6 = vld [vmem:[%s3456_s1 + $0x18] sm:$0xff]  ;;  %v16_v7 = vld [vmem:[%s3456_s1 + $0x10] sm:$0xff]  ;;  %v15_v8 = vld [vmem:[%s3456_s1 + $0x8] sm:$0xff] }
   0x4   :  { %1105 = vmatpush.msra.mxu2 %v22_v1  ;;  %1515 = vmatpush.msra.mxu3 %v22_v1  ;;  %v14_v9 = vld [vmem:[%s3456_s1] sm:$0xff]  ;;  %v2022_v10 = vld [vmem:[%s3457_s0 + $0x310] sm:$0xff]  ;;  %v2121_v11 = vld [vmem:[%s3457_s0 + $0x498] sm:$0xff] }
   0x5   :  { %236 = vmatpush.msra.mxu0 %v22_v1  ;;  %646 = vmatpush.msra.mxu1 %v22_v1  ;;  %v25_v12 = vld [vmem:[%s3457_s0] sm:$0xff]  ;;  %v1923_v13 = vld [vmem:[%s3457_s0 + $0x188] sm:$0xff]  ;;  %v2023_v14 = vld [vmem:[%s3457_s0 + $0x318] sm:$0xff] }
   0x6   :  { %1106 = vmatpush.msra.mxu2 %v21_v2  ;;  %1516 = vmatpush.msra.mxu3 %v21_v2  ;;  %v2122_v15 = vld [vmem:[%s3457_s0 + $0x4a0] sm:$0xff]  ;;  %v26_v16 = vld [vmem:[%s3457_s0 + $0x8] sm:$0xff]  ;;  %v1924_v17 = vld [vmem:[%s3457_s0 + $0x190] sm:$0xff] }
   0x7   :  { %237 = vmatpush.msra.mxu0 %v21_v2  ;;  %647 = vmatpush.msra.mxu1 %v21_v2  ;;  %v2024_v18 = vld [vmem:[%s3457_s0 + $0x320] sm:$0xff]  ;;  %v2123_v19 = vld [vmem:[%s3457_s0 + $0x4a8] sm:$0xff]  ;;  %v27_v20 = vld [vmem:[%s3457_s0 + $0x10] sm:$0xff] }
   0x8   :  { %1107 = vmatpush.msra.mxu2 %v20_v3  ;;  %1517 = vmatpush.msra.mxu3 %v20_v3  ;;  %v1925_v21 = vld [vmem:[%s3457_s0 + $0x198] sm:$0xff]  ;;  %v2025_v22 = vld [vmem:[%s3457_s0 + $0x328] sm:$0xff]  ;;  %v2124_v23 = vld [vmem:[%s3457_s0 + $0x4b0] sm:$0xff] }
   0x9   :  { %238 = vmatpush.msra.mxu0 %v20_v3  ;;  %648 = vmatpush.msra.mxu1 %v20_v3  ;;  %v28_v24 = vld [vmem:[%s3457_s0 + $0x18] sm:$0xff]  ;;  %v1926_v25 = vld [vmem:[%s3457_s0 + $0x1a0] sm:$0xff]  ;;  %v2026_v26 = vld [vmem:[%s3457_s0 + $0x330] sm:$0xff] }
   0xa   :  { %1108 = vmatpush.msra.mxu2 %v19_v4  ;;  %1518 = vmatpush.msra.mxu3 %v19_v4  ;;  %v2125_v27 = vld [vmem:[%s3457_s0 + $0x4b8] sm:$0xff]  ;;  %v29_v28 = vld [vmem:[%s3457_s0 + $0x20] sm:$0xff]  ;;  %v1927_v29 = vld [vmem:[%s3457_s0 + $0x1a8] sm:$0xff] }
   0xb   :  { %239 = vmatpush.msra.mxu0 %v19_v4  ;;  %649 = vmatpush.msra.mxu1 %v19_v4  ;;  %v2027_v30 = vld [vmem:[%s3457_s0 + $0x338] sm:$0xff]  ;;  %v2126_v31 = vld [vmem:[%s3457_s0 + $0x4c0] sm:$0xff]  ;;  %v30_v32 = vld [vmem:[%s3457_s0 + $0x28] sm:$0xff] }
   0xc   :  { %1109 = vmatpush.msra.mxu2 %v18_v5  ;;  %1519 = vmatpush.msra.mxu3 %v18_v5  ;;  %v1928_v33 = vld [vmem:[%s3457_s0 + $0x1b0] sm:$0xff]  ;;  %v2028_v34 = vld [vmem:[%s3457_s0 + $0x340] sm:$0xff]  ;;  %v2127_v35 = vld [vmem:[%s3457_s0 + $0x4c8] sm:$0xff] }
   0xd   :  { %240 = vmatpush.msra.mxu0 %v18_v5  ;;  %650 = vmatpush.msra.mxu1 %v18_v5  ;;  %v31_v36 = vld [vmem:[%s3457_s0 + $0x30] sm:$0xff]  ;;  %v1929_v37 = vld [vmem:[%s3457_s0 + $0x1b8] sm:$0xff]  ;;  %v2029_v38 = vld [vmem:[%s3457_s0 + $0x348] sm:$0xff] }
   0xe   :  { %1110 = vmatpush.msra.mxu2 %v17_v6  ;;  %1520 = vmatpush.msra.mxu3 %v17_v6  ;;  %v2128_v39 = vld [vmem:[%s3457_s0 + $0x4d0] sm:$0xff]  ;;  %v32_v40 = vld [vmem:[%s3457_s0 + $0x38] sm:$0xff]  ;;  %v1930_v41 = vld [vmem:[%s3457_s0 + $0x1c0] sm:$0xff] }
   0xf   :  { %241 = vmatpush.msra.mxu0 %v17_v6  ;;  %651 = vmatpush.msra.mxu1 %v17_v6  ;;  %v2030_v42 = vld [vmem:[%s3457_s0 + $0x350] sm:$0xff]  ;;  %v2129_v43 = vld [vmem:[%s3457_s0 + $0x4d8] sm:$0xff]  ;;  %v33_v44 = vld [vmem:[%s3457_s0 + $0x40] sm:$0xff] }
  0x10   :  { %1111 = vmatpush.msra.mxu2 %v16_v7  ;;  %1521 = vmatpush.msra.mxu3 %v16_v7  ;;  %v1931_v45 = vld [vmem:[%s3457_s0 + $0x1c8] sm:$0xff]  ;;  %v2031_v46 = vld [vmem:[%s3457_s0 + $0x358] sm:$0xff]  ;;  %v2130_v47 = vld [vmem:[%s3457_s0 + $0x4e0] sm:$0xff] }
  0x11   :  { %242 = vmatpush.msra.mxu0 %v16_v7  ;;  %652 = vmatpush.msra.mxu1 %v16_v7  ;;  %v34_v48 = vld [vmem:[%s3457_s0 + $0x48] sm:$0xff]  ;;  %v1932_v49 = vld [vmem:[%s3457_s0 + $0x1d0] sm:$0xff]  ;;  %v2032_v50 = vld [vmem:[%s3457_s0 + $0x360] sm:$0xff] }
  0x12   :  { %1112 = vmatpush.msra.mxu2 %v15_v8  ;;  %1522 = vmatpush.msra.mxu3 %v15_v8  ;;  %v2131_v51 = vld [vmem:[%s3457_s0 + $0x4e8] sm:$0xff]  ;;  %v35_v52 = vld [vmem:[%s3457_s0 + $0x50] sm:$0xff]  ;;  %v1933_v53 = vld [vmem:[%s3457_s0 + $0x1d8] sm:$0xff] }
  0x13   :  { %243 = vmatpush.msra.mxu0 %v15_v8  ;;  %653 = vmatpush.msra.mxu1 %v15_v8  ;;  %v2033_v54 = vld [vmem:[%s3457_s0 + $0x368] sm:$0xff]  ;;  %v2132_v55 = vld [vmem:[%s3457_s0 + $0x4f0] sm:$0xff]  ;;  %v36_v56 = vld [vmem:[%s3457_s0 + $0x58] sm:$0xff] }
  0x14   :  { %1113 = vmatpush.msra.mxu2 %v14_v9  ;;  %1523 = vmatpush.msra.mxu3 %v14_v9  ;;  %v1934_v57 = vld [vmem:[%s3457_s0 + $0x1e0] sm:$0xff]  ;;  %v2034_v58 = vld [vmem:[%s3457_s0 + $0x370] sm:$0xff]  ;;  %v2133_v59 = vld [vmem:[%s3457_s0 + $0x4f8] sm:$0xff] }
  0x15   :  { %2072 = vmatmul.msk.f32.vlgmr.msra.gmra.mxu2 %vm77_vm1, %v2022_v10  ;;  %2171 = vmatmul.msk.f32.vlgmr.msra.gmra.mxu3 %vm77_vm1, %v2121_v11  ;;  %v37_v60 = vld [vmem:[%s3457_s0 + $0x60] sm:$0xff]  ;;  %v1935_v61 = vld [vmem:[%s3457_s0 + $0x1e8] sm:$0xff]  ;;  %v2035_v62 = vld [vmem:[%s3457_s0 + $0x378] sm:$0xff] }
  0x16   :  { %244 = vmatpush.msra.mxu0 %v14_v9  ;;  %654 = vmatpush.msra.mxu1 %v14_v9  ;;  %v2134_v63 = vld [vmem:[%s3457_s0 + $0x500] sm:$0xff]  ;;  %v38_v0 = vld [vmem:[%s3457_s0 + $0x68] sm:$0xff]  ;;  %v1936_v1 = vld [vmem:[%s3457_s0 + $0x1f0] sm:$0xff] }
  0x17   :  { %1874 = vmatmul.msk.f32.vlgmr.msra.gmra.mxu0 %vm77_vm1, %v25_v12  ;;  %1973 = vmatmul.msk.f32.vlgmr.msra.gmra.mxu1 %vm77_vm1, %v1923_v13  ;;  %v2036_v2 = vld [vmem:[%s3457_s0 + $0x380] sm:$0xff]  ;;  %v2135_v3 = vld [vmem:[%s3457_s0 + $0x508] sm:$0xff]  ;;  %v39_v4 = vld [vmem:[%s3457_s0 + $0x70] sm:$0xff] }
  0x18   :  { %v1937_v5 = vld [vmem:[%s3457_s0 + $0x1f8] sm:$0xff]  ;;  %v2037_v6 = vld [vmem:[%s3457_s0 + $0x388] sm:$0xff]  ;;  %v2136_v7 = vld [vmem:[%s3457_s0 + $0x510] sm:$0xff] }
  0x19   :  { %v40_v8 = vld [vmem:[%s3457_s0 + $0x78] sm:$0xff]  ;;  %v1938_v9 = vld [vmem:[%s3457_s0 + $0x200] sm:$0xff]  ;;  %v2038_v11 = vld [vmem:[%s3457_s0 + $0x390] sm:$0xff] }
  0x1a   :  { %v2532_v10 = vld [vmem:[%s3458_s2] ss:$0 sm:$0xff]  ;;  %v2137_v12 = vld [vmem:[%s3457_s0 + $0x518] sm:$0xff] }
  0x1d   :  { %2073 = vmatmul.msk.f32.gmra.mxu2 %vm77_vm1, %v2023_v14  ;;  %2172 = vmatmul.msk.f32.gmra.mxu3 %vm77_vm1, %v2122_v15  ;;  %v41_v15 = vld [vmem:[%s3457_s0 + $0x80] sm:$0xff] }
  0x1f   :  { %1875 = vmatmul.msk.f32.gmra.mxu0 %vm77_vm1, %v26_v16  ;;  %1974 = vmatmul.msk.f32.gmra.mxu1 %vm77_vm1, %v1924_v17  ;;  %v1939_v16 = vld [vmem:[%s3457_s0 + $0x208] sm:$0xff] }
  0x25   :  { %2074 = vmatmul.msk.f32.gmra.mxu2 %vm77_vm1, %v2024_v18  ;;  %2173 = vmatmul.msk.f32.gmra.mxu3 %vm77_vm1, %v2123_v19 }
  0x27   :  { %1876 = vmatmul.msk.f32.gmra.mxu0 %vm77_vm1, %v27_v20  ;;  %1975 = vmatmul.msk.f32.gmra.mxu1 %vm77_vm1, %v1925_v21 }
  0x2d   :  { %2075 = vmatmul.msk.f32.gmra.mxu2 %vm77_vm1, %v2025_v22  ;;  %2174 = vmatmul.msk.f32.gmra.mxu3 %vm77_vm1, %v2124_v23 }
  0x2f   :  { %1877 = vmatmul.msk.f32.gmra.mxu0 %vm77_vm1, %v28_v24  ;;  %1976 = vmatmul.msk.f32.gmra.mxu1 %vm77_vm1, %v1926_v25  ;;  %v2039_v25 = vld [vmem:[%s3457_s0 + $0x398] sm:$0xff] }
  0x35   :  { %2076 = vmatmul.msk.f32.gmra.mxu2 %vm77_vm1, %v2026_v26  ;;  %2175 = vmatmul.msk.f32.gmra.mxu3 %vm77_vm1, %v2125_v27  ;;  %v2138_v26 = vld [vmem:[%s3457_s0 + $0x520] sm:$0xff] }
  0x37   :  { %1878 = vmatmul.msk.f32.gmra.mxu0 %vm77_vm1, %v29_v28  ;;  %1977 = vmatmul.msk.f32.gmra.mxu1 %vm77_vm1, %v1927_v29 }
  0x3d   :  { %2077 = vmatmul.msk.f32.gmra.mxu2 %vm77_vm1, %v2027_v30  ;;  %2176 = vmatmul.msk.f32.gmra.mxu3 %vm77_vm1, %v2126_v31 }
  0x3f   :  { %1879 = vmatmul.msk.f32.gmra.mxu0 %vm77_vm1, %v30_v32  ;;  %1978 = vmatmul.msk.f32.gmra.mxu1 %vm77_vm1, %v1928_v33  ;;  %v42_v32 = vld [vmem:[%s3457_s0 + $0x88] sm:$0xff]  ;;  %v1940_v33 = vld [vmem:[%s3457_s0 + $0x210] sm:$0xff] }
  0x45   :  { %2078 = vmatmul.msk.f32.gmra.mxu2 %vm77_vm1, %v2028_v34  ;;  %2177 = vmatmul.msk.f32.gmra.mxu3 %vm77_vm1, %v2127_v35 }
  0x47   :  { %1880 = vmatmul.msk.f32.gmra.mxu0 %vm77_vm1, %v31_v36  ;;  %1979 = vmatmul.msk.f32.gmra.mxu1 %vm77_vm1, %v1929_v37 }
  0x4d   :  { %2079 = vmatmul.msk.f32.gmra.mxu2 %vm77_vm1, %v2029_v38  ;;  %2178 = vmatmul.msk.f32.gmra.mxu3 %vm77_vm1, %v2128_v39 }
  0x4f   :  { %1881 = vmatmul.msk.f32.gmra.mxu0 %vm77_vm1, %v32_v40  ;;  %1980 = vmatmul.msk.f32.gmra.mxu1 %vm77_vm1, %v1930_v41 }
  0x55   :  { %2080 = vmatmul.msk.f32.gmra.mxu2 %vm77_vm1, %v2030_v42  ;;  %2179 = vmatmul.msk.f32.gmra.mxu3 %vm77_vm1, %v2129_v43 }
  0x57   :  { %1882 = vmatmul.msk.f32.gmra.mxu0 %vm77_vm1, %v33_v44  ;;  %1981 = vmatmul.msk.f32.gmra.mxu1 %vm77_vm1, %v1931_v45  ;;  %v2040_v44 = vld [vmem:[%s3457_s0 + $0x3a0] sm:$0xff]  ;;  %v2139_v45 = vld [vmem:[%s3457_s0 + $0x528] sm:$0xff] }
  0x5d   :  { %2081 = vmatmul.msk.f32.gmra.mxu2 %vm77_vm1, %v2031_v46  ;;  %2180 = vmatmul.msk.f32.gmra.mxu3 %vm77_vm1, %v2130_v47 }
  0x5f   :  { %1883 = vmatmul.msk.f32.gmra.mxu0 %vm77_vm1, %v34_v48  ;;  %1982 = vmatmul.msk.f32.gmra.mxu1 %vm77_vm1, %v1932_v49 }
  0x65   :  { %2082 = vmatmul.msk.f32.gmra.mxu2 %vm77_vm1, %v2032_v50  ;;  %2181 = vmatmul.msk.f32.gmra.mxu3 %vm77_vm1, %v2131_v51  ;;  %v43_v51 = vld [vmem:[%s3457_s0 + $0x90] sm:$0xff] }
  0x67   :  { %1884 = vmatmul.msk.f32.gmra.mxu0 %vm77_vm1, %v35_v52  ;;  %1983 = vmatmul.msk.f32.gmra.mxu1 %vm77_vm1, %v1933_v53  ;;  %v1941_v52 = vld [vmem:[%s3457_s0 + $0x218] sm:$0xff] }
  0x6d   :  { %2083 = vmatmul.msk.f32.gmra.mxu2 %vm77_vm1, %v2033_v54  ;;  %2182 = vmatmul.msk.f32.gmra.mxu3 %vm77_vm1, %v2132_v55 }
  0x6f   :  { %1885 = vmatmul.msk.f32.gmra.mxu0 %vm77_vm1, %v36_v56  ;;  %1984 = vmatmul.msk.f32.gmra.mxu1 %vm77_vm1, %v1934_v57 }
  0x75   :  { %2084 = vmatmul.msk.f32.gmra.mxu2 %vm77_vm1, %v2034_v58  ;;  %2183 = vmatmul.msk.f32.gmra.mxu3 %vm77_vm1, %v2133_v59 }
  0x77   :  { %1886 = vmatmul.msk.f32.gmra.mxu0 %vm77_vm1, %v37_v60  ;;  %1985 = vmatmul.msk.f32.gmra.mxu1 %vm77_vm1, %v1935_v61 }
  0x7d   :  { %2085 = vmatmul.msk.f32.gmra.mxu2 %vm77_vm1, %v2035_v62  ;;  %2184 = vmatmul.msk.f32.gmra.mxu3 %vm77_vm1, %v2134_v63  ;;  %v2041_v63 = vld [vmem:[%s3457_s0 + $0x3a8] sm:$0xff] }
  0x7f   :  { %1887 = vmatmul.msk.f32.gmra.mxu0 %vm77_vm1, %v38_v0  ;;  %1986 = vmatmul.msk.f32.gmra.mxu1 %vm77_vm1, %v1936_v1  ;;  %v2140_v0 = vld [vmem:[%s3457_s0 + $0x530] sm:$0xff] }
  0x85   :  { %2086 = vmatmul.msk.f32.gmra.mxu2 %vm77_vm1, %v2036_v2  ;;  %2185 = vmatmul.msk.f32.gmra.mxu3 %vm77_vm1, %v2135_v3 }
  0x87   :  { %1888 = vmatmul.msk.f32.gmra.mxu0 %vm77_vm1, %v39_v4  ;;  %1987 = vmatmul.msk.f32.gmra.mxu1 %vm77_vm1, %v1937_v5 }
  0x8d   :  { %2087 = vmatmul.msk.f32.gmra.mxu2 %vm77_vm1, %v2037_v6  ;;  %2186 = vmatmul.msk.f32.gmra.mxu3 %vm77_vm1, %v2136_v7  ;;  %v44_v6 = vld [vmem:[%s3457_s0 + $0x98] sm:$0xff]  ;;  %v1942_v7 = vld [vmem:[%s3457_s0 + $0x220] sm:$0xff] }
  0x8f   :  { %1889 = vmatmul.msk.f32.gmra.mxu0 %vm77_vm1, %v40_v8  ;;  %1988 = vmatmul.msk.f32.gmra.mxu1 %vm77_vm1, %v1938_v9 }
  0x94   :  { %v246_v13 = vpop.f32.mrf.mxu0  ;;  %v656_v14 = vpop.f32.mrf.mxu1 }
  0x95   :  { %2088 = vmatmul.msk.f32.gmra.mxu2 %vm77_vm1, %v2038_v11  ;;  %2187 = vmatmul.msk.f32.gmra.mxu3 %vm77_vm1, %v2137_v12  ;;  %v247_v17 = vadd.f32 %v2532_v10, %v246_v13  ;;  %v657_v18 = vadd.f32 %v2532_v10, %v656_v14 }
  0x97   :  { %v393_v19 = vmax.f32 %v247_v17, 0.0  ;;  %v803_v20 = vmax.f32 %v657_v18, 0.0  ;;  %1890 = vmatmul.msk.f32.gmra.mxu0 %vm77_vm1, %v41_v15  ;;  %1989 = vmatmul.msk.f32.gmra.mxu1 %vm77_vm1, %v1939_v16 }
  0x98   :  { %v1115_v21 = vpop.f32.mrf.mxu2  ;;  %v1525_v22 = vpop.f32.mrf.mxu3 }
  0x99   :  { %v1116_v23 = vadd.f32 %v2532_v10, %v1115_v21  ;;  %v1526_v24 = vadd.f32 %v2532_v10, %v1525_v22  ;;  %v852_v27 = vmax.f32 %v393_v19, %v803_v20  ;;  %v2042_v19 = vld [vmem:[%s3457_s0 + $0x3b0] sm:$0xff]  ;;  %v2141_v20 = vld [vmem:[%s3457_s0 + $0x538] sm:$0xff] }
  0x9b   :  { %v1262_v28 = vmax.f32 %v1116_v23, 0.0  ;;  %v1672_v29 = vmax.f32 %v1526_v24, 0.0 }
  0x9c   :  { %v249_v30 = vpop.f32.mrf.mxu0  ;;  %v659_v31 = vpop.f32.mrf.mxu1 }
  0x9d   :  { %v1721_v34 = vmax.f32 %v1262_v28, %v1672_v29  ;;  %2089 = vmatmul.msk.f32.gmra.mxu2 %vm77_vm1, %v2039_v25  ;;  %2188 = vmatmul.msk.f32.gmra.mxu3 %vm77_vm1, %v2138_v26  ;;  %v250_v35 = vadd.f32 %v2532_v10, %v249_v30  ;;  %v660_v36 = vadd.f32 %v2532_v10, %v659_v31  ;;  %v45_v26 = vld [vmem:[%s3457_s0 + $0xa0] sm:$0xff] }
  0x9f   :  { %v1770_v37 = vmax.f32 %v852_v27, %v1721_v34  ;;  %v394_v38 = vmax.f32 %v250_v35, 0.0  ;;  %v804_v39 = vmax.f32 %v660_v36, 0.0  ;;  %1891 = vmatmul.msk.f32.gmra.mxu0 %vm77_vm1, %v42_v32  ;;  %1990 = vmatmul.msk.f32.gmra.mxu1 %vm77_vm1, %v1940_v33  ;;  %v1943_v27 = vld [vmem:[%s3457_s0 + $0x228] sm:$0xff] }
  0xa0   :  { %v1118_v40 = vpop.f32.mrf.mxu2  ;;  %v1528_v41 = vpop.f32.mrf.mxu3 }
  0xa1   :  { %1820 = vst.msk [vmem:[%s3459_s3] sm:$0xff] %vm1819_vm2, %v1770_v37  ;;  %v1119_v42 = vadd.f32 %v2532_v10, %v1118_v40  ;;  %v1529_v43 = vadd.f32 %v2532_v10, %v1528_v41  ;;  %v853_v46 = vmax.f32 %v394_v38, %v804_v39  ;;  %v2043_v38 = vld [vmem:[%s3457_s0 + $0x3b8] sm:$0xff]  ;;  %v2142_v39 = vld [vmem:[%s3457_s0 + $0x540] sm:$0xff] }
  0xa3   :  { %v1263_v47 = vmax.f32 %v1119_v42, 0.0  ;;  %v1673_v48 = vmax.f32 %v1529_v43, 0.0 }
  0xa4   :  { %v252_v49 = vpop.f32.mrf.mxu0  ;;  %v662_v50 = vpop.f32.mrf.mxu1 }
  0xa5   :  { %v1722_v53 = vmax.f32 %v1263_v47, %v1673_v48  ;;  %2090 = vmatmul.msk.f32.gmra.mxu2 %vm77_vm1, %v2040_v44  ;;  %2189 = vmatmul.msk.f32.gmra.mxu3 %vm77_vm1, %v2139_v45  ;;  %v253_v54 = vadd.f32 %v2532_v10, %v252_v49  ;;  %v663_v55 = vadd.f32 %v2532_v10, %v662_v50  ;;  %v46_v45 = vld [vmem:[%s3457_s0 + $0xa8] sm:$0xff] }
  0xa7   :  { %v1771_v56 = vmax.f32 %v853_v46, %v1722_v53  ;;  %v395_v57 = vmax.f32 %v253_v54, 0.0  ;;  %v805_v58 = vmax.f32 %v663_v55, 0.0  ;;  %1892 = vmatmul.msk.f32.gmra.mxu0 %vm77_vm1, %v43_v51  ;;  %1991 = vmatmul.msk.f32.gmra.mxu1 %vm77_vm1, %v1941_v52  ;;  %v1944_v46 = vld [vmem:[%s3457_s0 + $0x230] sm:$0xff] }
  0xa8   :  { %v1121_v59 = vpop.f32.mrf.mxu2  ;;  %v1531_v60 = vpop.f32.mrf.mxu3 }
  0xa9   :  { %1821 = vst.msk [vmem:[%s3459_s3 + $0x8] sm:$0xff] %vm1819_vm2, %v1771_v56  ;;  %v1122_v61 = vadd.f32 %v2532_v10, %v1121_v59  ;;  %v1532_v62 = vadd.f32 %v2532_v10, %v1531_v60  ;;  %v854_v1 = vmax.f32 %v395_v57, %v805_v58  ;;  %v2044_v57 = vld [vmem:[%s3457_s0 + $0x3c0] sm:$0xff]  ;;  %v2143_v58 = vld [vmem:[%s3457_s0 + $0x548] sm:$0xff] }
  0xab   :  { %v1264_v2 = vmax.f32 %v1122_v61, 0.0  ;;  %v1674_v3 = vmax.f32 %v1532_v62, 0.0 }
  0xac   :  { %v255_v4 = vpop.f32.mrf.mxu0  ;;  %v665_v5 = vpop.f32.mrf.mxu1 }
  0xad   :  { %v1723_v8 = vmax.f32 %v1264_v2, %v1674_v3  ;;  %2091 = vmatmul.msk.f32.gmra.mxu2 %vm77_vm1, %v2041_v63  ;;  %2190 = vmatmul.msk.f32.gmra.mxu3 %vm77_vm1, %v2140_v0  ;;  %v256_v9 = vadd.f32 %v2532_v10, %v255_v4  ;;  %v666_v11 = vadd.f32 %v2532_v10, %v665_v5  ;;  %v47_v0 = vld [vmem:[%s3457_s0 + $0xb0] sm:$0xff] }
  0xaf   :  { %v1772_v12 = vmax.f32 %v854_v1, %v1723_v8  ;;  %v396_v13 = vmax.f32 %v256_v9, 0.0  ;;  %v806_v14 = vmax.f32 %v666_v11, 0.0  ;;  %1893 = vmatmul.msk.f32.gmra.mxu0 %vm77_vm1, %v44_v6  ;;  %1992 = vmatmul.msk.f32.gmra.mxu1 %vm77_vm1, %v1942_v7  ;;  %v1945_v1 = vld [vmem:[%s3457_s0 + $0x238] sm:$0xff] }
  0xb0   :  { %v1124_v15 = vpop.f32.mrf.mxu2  ;;  %v1534_v16 = vpop.f32.mrf.mxu3 }
  0xb1   :  { %1822 = vst.msk [vmem:[%s3459_s3 + $0x10] sm:$0xff] %vm1819_vm2, %v1772_v12  ;;  %v1125_v17 = vadd.f32 %v2532_v10, %v1124_v15  ;;  %v1535_v18 = vadd.f32 %v2532_v10, %v1534_v16  ;;  %v855_v21 = vmax.f32 %v396_v13, %v806_v14  ;;  %v2045_v13 = vld [vmem:[%s3457_s0 + $0x3c8] sm:$0xff]  ;;  %v2144_v14 = vld [vmem:[%s3457_s0 + $0x550] sm:$0xff] }
  0xb3   :  { %v1265_v22 = vmax.f32 %v1125_v17, 0.0  ;;  %v1675_v23 = vmax.f32 %v1535_v18, 0.0 }
  0xb4   :  { %v258_v24 = vpop.f32.mrf.mxu0  ;;  %v668_v25 = vpop.f32.mrf.mxu1 }
  0xb5   :  { %v1724_v28 = vmax.f32 %v1265_v22, %v1675_v23  ;;  %2092 = vmatmul.msk.f32.gmra.mxu2 %vm77_vm1, %v2042_v19  ;;  %2191 = vmatmul.msk.f32.gmra.mxu3 %vm77_vm1, %v2141_v20  ;;  %v259_v29 = vadd.f32 %v2532_v10, %v258_v24  ;;  %v669_v30 = vadd.f32 %v2532_v10, %v668_v25  ;;  %v48_v20 = vld [vmem:[%s3457_s0 + $0xb8] sm:$0xff] }
  0xb7   :  { %v1773_v31 = vmax.f32 %v855_v21, %v1724_v28  ;;  %v397_v32 = vmax.f32 %v259_v29, 0.0  ;;  %v807_v33 = vmax.f32 %v669_v30, 0.0  ;;  %1894 = vmatmul.msk.f32.gmra.mxu0 %vm77_vm1, %v45_v26  ;;  %1993 = vmatmul.msk.f32.gmra.mxu1 %vm77_vm1, %v1943_v27  ;;  %v1946_v21 = vld [vmem:[%s3457_s0 + $0x240] sm:$0xff] }
  0xb8   :  { %v1127_v34 = vpop.f32.mrf.mxu2  ;;  %v1537_v35 = vpop.f32.mrf.mxu3 }
  0xb9   :  { %1823 = vst.msk [vmem:[%s3459_s3 + $0x18] sm:$0xff] %vm1819_vm2, %v1773_v31  ;;  %v1128_v36 = vadd.f32 %v2532_v10, %v1127_v34  ;;  %v1538_v37 = vadd.f32 %v2532_v10, %v1537_v35  ;;  %v856_v40 = vmax.f32 %v397_v32, %v807_v33  ;;  %v2046_v32 = vld [vmem:[%s3457_s0 + $0x3d0] sm:$0xff]  ;;  %v2145_v33 = vld [vmem:[%s3457_s0 + $0x558] sm:$0xff] }
  0xbb   :  { %v1266_v41 = vmax.f32 %v1128_v36, 0.0  ;;  %v1676_v42 = vmax.f32 %v1538_v37, 0.0 }
  0xbc   :  { %v261_v43 = vpop.f32.mrf.mxu0  ;;  %v671_v44 = vpop.f32.mrf.mxu1 }
  0xbd   :  { %v1725_v47 = vmax.f32 %v1266_v41, %v1676_v42  ;;  %2093 = vmatmul.msk.f32.gmra.mxu2 %vm77_vm1, %v2043_v38  ;;  %2192 = vmatmul.msk.f32.gmra.mxu3 %vm77_vm1, %v2142_v39  ;;  %v262_v48 = vadd.f32 %v2532_v10, %v261_v43  ;;  %v672_v49 = vadd.f32 %v2532_v10, %v671_v44  ;;  %v49_v39 = vld [vmem:[%s3457_s0 + $0xc0] sm:$0xff] }
  0xbf   :  { %v1774_v50 = vmax.f32 %v856_v40, %v1725_v47  ;;  %v398_v51 = vmax.f32 %v262_v48, 0.0  ;;  %v808_v52 = vmax.f32 %v672_v49, 0.0  ;;  %1895 = vmatmul.msk.f32.gmra.mxu0 %vm77_vm1, %v46_v45  ;;  %1994 = vmatmul.msk.f32.gmra.mxu1 %vm77_vm1, %v1944_v46  ;;  %v1947_v40 = vld [vmem:[%s3457_s0 + $0x248] sm:$0xff] }
  0xc0   :  { %v1130_v53 = vpop.f32.mrf.mxu2  ;;  %v1540_v54 = vpop.f32.mrf.mxu3 }
  0xc1   :  { %1824 = vst.msk [vmem:[%s3459_s3 + $0x20] sm:$0xff] %vm1819_vm2, %v1774_v50  ;;  %v1131_v55 = vadd.f32 %v2532_v10, %v1130_v53  ;;  %v1541_v56 = vadd.f32 %v2532_v10, %v1540_v54  ;;  %v857_v59 = vmax.f32 %v398_v51, %v808_v52  ;;  %v2047_v51 = vld [vmem:[%s3457_s0 + $0x3d8] sm:$0xff]  ;;  %v2146_v52 = vld [vmem:[%s3457_s0 + $0x560] sm:$0xff] }
  0xc3   :  { %v1267_v60 = vmax.f32 %v1131_v55, 0.0  ;;  %v1677_v61 = vmax.f32 %v1541_v56, 0.0 }
  0xc4   :  { %v264_v62 = vpop.f32.mrf.mxu0  ;;  %v674_v63 = vpop.f32.mrf.mxu1 }
  0xc5   :  { %v1726_v2 = vmax.f32 %v1267_v60, %v1677_v61  ;;  %2094 = vmatmul.msk.f32.gmra.mxu2 %vm77_vm1, %v2044_v57  ;;  %2193 = vmatmul.msk.f32.gmra.mxu3 %vm77_vm1, %v2143_v58  ;;  %v265_v3 = vadd.f32 %v2532_v10, %v264_v62  ;;  %v675_v4 = vadd.f32 %v2532_v10, %v674_v63  ;;  %v50_v58 = vld [vmem:[%s3457_s0 + $0xc8] sm:$0xff] }
  0xc7   :  { %v1775_v5 = vmax.f32 %v857_v59, %v1726_v2  ;;  %v399_v6 = vmax.f32 %v265_v3, 0.0  ;;  %v809_v7 = vmax.f32 %v675_v4, 0.0  ;;  %1896 = vmatmul.msk.f32.gmra.mxu0 %vm77_vm1, %v47_v0  ;;  %1995 = vmatmul.msk.f32.gmra.mxu1 %vm77_vm1, %v1945_v1  ;;  %v1948_v59 = vld [vmem:[%s3457_s0 + $0x250] sm:$0xff] }
  0xc8   :  { %v1133_v8 = vpop.f32.mrf.mxu2  ;;  %v1543_v9 = vpop.f32.mrf.mxu3 }
  0xc9   :  { %1825 = vst.msk [vmem:[%s3459_s3 + $0x28] sm:$0xff] %vm1819_vm2, %v1775_v5  ;;  %v1134_v11 = vadd.f32 %v2532_v10, %v1133_v8  ;;  %v1544_v12 = vadd.f32 %v2532_v10, %v1543_v9  ;;  %v858_v15 = vmax.f32 %v399_v6, %v809_v7  ;;  %v2048_v6 = vld [vmem:[%s3457_s0 + $0x3e0] sm:$0xff]  ;;  %v2147_v7 = vld [vmem:[%s3457_s0 + $0x568] sm:$0xff] }
  0xcb   :  { %v1268_v16 = vmax.f32 %v1134_v11, 0.0  ;;  %v1678_v17 = vmax.f32 %v1544_v12, 0.0 }
  0xcc   :  { %v267_v18 = vpop.f32.mrf.mxu0  ;;  %v677_v19 = vpop.f32.mrf.mxu1 }
  0xcd   :  { %v1727_v22 = vmax.f32 %v1268_v16, %v1678_v17  ;;  %2095 = vmatmul.msk.f32.gmra.mxu2 %vm77_vm1, %v2045_v13  ;;  %2194 = vmatmul.msk.f32.gmra.mxu3 %vm77_vm1, %v2144_v14  ;;  %v268_v23 = vadd.f32 %v2532_v10, %v267_v18  ;;  %v678_v24 = vadd.f32 %v2532_v10, %v677_v19  ;;  %v51_v14 = vld [vmem:[%s3457_s0 + $0xd0] sm:$0xff] }
  0xcf   :  { %v1776_v25 = vmax.f32 %v858_v15, %v1727_v22  ;;  %v400_v26 = vmax.f32 %v268_v23, 0.0  ;;  %v810_v27 = vmax.f32 %v678_v24, 0.0  ;;  %1897 = vmatmul.msk.f32.gmra.mxu0 %vm77_vm1, %v48_v20  ;;  %1996 = vmatmul.msk.f32.gmra.mxu1 %vm77_vm1, %v1946_v21  ;;  %v1949_v15 = vld [vmem:[%s3457_s0 + $0x258] sm:$0xff] }
  0xd0   :  { %v1136_v28 = vpop.f32.mrf.mxu2  ;;  %v1546_v29 = vpop.f32.mrf.mxu3 }
  0xd1   :  { %1826 = vst.msk [vmem:[%s3459_s3 + $0x30] sm:$0xff] %vm1819_vm2, %v1776_v25  ;;  %v1137_v30 = vadd.f32 %v2532_v10, %v1136_v28  ;;  %v1547_v31 = vadd.f32 %v2532_v10, %v1546_v29  ;;  %v859_v34 = vmax.f32 %v400_v26, %v810_v27  ;;  %v2049_v26 = vld [vmem:[%s3457_s0 + $0x3e8] sm:$0xff]  ;;  %v2148_v27 = vld [vmem:[%s3457_s0 + $0x570] sm:$0xff] }
  0xd3   :  { %v1269_v35 = vmax.f32 %v1137_v30, 0.0  ;;  %v1679_v36 = vmax.f32 %v1547_v31, 0.0 }
  0xd4   :  { %v270_v37 = vpop.f32.mrf.mxu0  ;;  %v680_v38 = vpop.f32.mrf.mxu1 }
  0xd5   :  { %v1728_v41 = vmax.f32 %v1269_v35, %v1679_v36  ;;  %2096 = vmatmul.msk.f32.gmra.mxu2 %vm77_vm1, %v2046_v32  ;;  %2195 = vmatmul.msk.f32.gmra.mxu3 %vm77_vm1, %v2145_v33  ;;  %v271_v42 = vadd.f32 %v2532_v10, %v270_v37  ;;  %v681_v43 = vadd.f32 %v2532_v10, %v680_v38  ;;  %v52_v33 = vld [vmem:[%s3457_s0 + $0xd8] sm:$0xff] }
  0xd7   :  { %v1777_v44 = vmax.f32 %v859_v34, %v1728_v41  ;;  %v401_v45 = vmax.f32 %v271_v42, 0.0  ;;  %v811_v46 = vmax.f32 %v681_v43, 0.0  ;;  %1898 = vmatmul.msk.f32.gmra.mxu0 %vm77_vm1, %v49_v39  ;;  %1997 = vmatmul.msk.f32.gmra.mxu1 %vm77_vm1, %v1947_v40  ;;  %v1950_v34 = vld [vmem:[%s3457_s0 + $0x260] sm:$0xff] }
  0xd8   :  { %v1139_v47 = vpop.f32.mrf.mxu2  ;;  %v1549_v48 = vpop.f32.mrf.mxu3 }
  0xd9   :  { %1827 = vst.msk [vmem:[%s3459_s3 + $0x38] sm:$0xff] %vm1819_vm2, %v1777_v44  ;;  %v1140_v49 = vadd.f32 %v2532_v10, %v1139_v47  ;;  %v1550_v50 = vadd.f32 %v2532_v10, %v1549_v48  ;;  %v860_v53 = vmax.f32 %v401_v45, %v811_v46  ;;  %v2050_v45 = vld [vmem:[%s3457_s0 + $0x3f0] sm:$0xff]  ;;  %v2149_v46 = vld [vmem:[%s3457_s0 + $0x578] sm:$0xff] }
  0xdb   :  { %v1270_v54 = vmax.f32 %v1140_v49, 0.0  ;;  %v1680_v55 = vmax.f32 %v1550_v50, 0.0 }
  0xdc   :  { %v273_v56 = vpop.f32.mrf.mxu0  ;;  %v683_v57 = vpop.f32.mrf.mxu1 }
  0xdd   :  { %v1729_v60 = vmax.f32 %v1270_v54, %v1680_v55  ;;  %2097 = vmatmul.msk.f32.gmra.mxu2 %vm77_vm1, %v2047_v51  ;;  %2196 = vmatmul.msk.f32.gmra.mxu3 %vm77_vm1, %v2146_v52  ;;  %v274_v61 = vadd.f32 %v2532_v10, %v273_v56  ;;  %v684_v62 = vadd.f32 %v2532_v10, %v683_v57  ;;  %v53_v52 = vld [vmem:[%s3457_s0 + $0xe0] sm:$0xff] }
  0xdf   :  { %v1778_v63 = vmax.f32 %v860_v53, %v1729_v60  ;;  %v402_v0 = vmax.f32 %v274_v61, 0.0  ;;  %v812_v1 = vmax.f32 %v684_v62, 0.0  ;;  %1899 = vmatmul.msk.f32.gmra.mxu0 %vm77_vm1, %v50_v58  ;;  %1998 = vmatmul.msk.f32.gmra.mxu1 %vm77_vm1, %v1948_v59  ;;  %v1951_v53 = vld [vmem:[%s3457_s0 + $0x268] sm:$0xff] }
  0xe0   :  { %v1142_v2 = vpop.f32.mrf.mxu2  ;;  %v1552_v3 = vpop.f32.mrf.mxu3 }
  0xe1   :  { %1828 = vst.msk [vmem:[%s3459_s3 + $0x40] sm:$0xff] %vm1819_vm2, %v1778_v63  ;;  %v1143_v4 = vadd.f32 %v2532_v10, %v1142_v2  ;;  %v1553_v5 = vadd.f32 %v2532_v10, %v1552_v3  ;;  %v861_v8 = vmax.f32 %v402_v0, %v812_v1  ;;  %v2051_v0 = vld [vmem:[%s3457_s0 + $0x3f8] sm:$0xff]  ;;  %v2150_v1 = vld [vmem:[%s3457_s0 + $0x580] sm:$0xff] }
  0xe3   :  { %v1271_v9 = vmax.f32 %v1143_v4, 0.0  ;;  %v1681_v11 = vmax.f32 %v1553_v5, 0.0 }
  0xe4   :  { %v276_v12 = vpop.f32.mrf.mxu0  ;;  %v686_v13 = vpop.f32.mrf.mxu1 }
  0xe5   :  { %v1730_v16 = vmax.f32 %v1271_v9, %v1681_v11  ;;  %2098 = vmatmul.msk.f32.gmra.mxu2 %vm77_vm1, %v2048_v6  ;;  %2197 = vmatmul.msk.f32.gmra.mxu3 %vm77_vm1, %v2147_v7  ;;  %v277_v17 = vadd.f32 %v2532_v10, %v276_v12  ;;  %v687_v18 = vadd.f32 %v2532_v10, %v686_v13  ;;  %v54_v7 = vld [vmem:[%s3457_s0 + $0xe8] sm:$0xff] }
  0xe7   :  { %v1779_v19 = vmax.f32 %v861_v8, %v1730_v16  ;;  %v403_v20 = vmax.f32 %v277_v17, 0.0  ;;  %v813_v21 = vmax.f32 %v687_v18, 0.0  ;;  %1900 = vmatmul.msk.f32.gmra.mxu0 %vm77_vm1, %v51_v14  ;;  %1999 = vmatmul.msk.f32.gmra.mxu1 %vm77_vm1, %v1949_v15  ;;  %v1952_v8 = vld [vmem:[%s3457_s0 + $0x270] sm:$0xff] }
  0xe8   :  { %v1145_v22 = vpop.f32.mrf.mxu2  ;;  %v1555_v23 = vpop.f32.mrf.mxu3 }
  0xe9   :  { %1829 = vst.msk [vmem:[%s3459_s3 + $0x48] sm:$0xff] %vm1819_vm2, %v1779_v19  ;;  %v1146_v24 = vadd.f32 %v2532_v10, %v1145_v22  ;;  %v1556_v25 = vadd.f32 %v2532_v10, %v1555_v23  ;;  %v862_v28 = vmax.f32 %v403_v20, %v813_v21  ;;  %v2052_v20 = vld [vmem:[%s3457_s0 + $0x400] sm:$0xff]  ;;  %v2151_v21 = vld [vmem:[%s3457_s0 + $0x588] sm:$0xff] }
  0xeb   :  { %v1272_v29 = vmax.f32 %v1146_v24, 0.0  ;;  %v1682_v30 = vmax.f32 %v1556_v25, 0.0 }
  0xec   :  { %v279_v31 = vpop.f32.mrf.mxu0  ;;  %v689_v32 = vpop.f32.mrf.mxu1 }
  0xed   :  { %v1731_v35 = vmax.f32 %v1272_v29, %v1682_v30  ;;  %2099 = vmatmul.msk.f32.gmra.mxu2 %vm77_vm1, %v2049_v26  ;;  %2198 = vmatmul.msk.f32.gmra.mxu3 %vm77_vm1, %v2148_v27  ;;  %v280_v36 = vadd.f32 %v2532_v10, %v279_v31  ;;  %v690_v37 = vadd.f32 %v2532_v10, %v689_v32  ;;  %v55_v27 = vld [vmem:[%s3457_s0 + $0xf0] sm:$0xff] }
  0xef   :  { %v1780_v38 = vmax.f32 %v862_v28, %v1731_v35  ;;  %v404_v39 = vmax.f32 %v280_v36, 0.0  ;;  %v814_v40 = vmax.f32 %v690_v37, 0.0  ;;  %1901 = vmatmul.msk.f32.gmra.mxu0 %vm77_vm1, %v52_v33  ;;  %2000 = vmatmul.msk.f32.gmra.mxu1 %vm77_vm1, %v1950_v34  ;;  %v1953_v28 = vld [vmem:[%s3457_s0 + $0x278] sm:$0xff] }
  0xf0   :  { %v1148_v41 = vpop.f32.mrf.mxu2  ;;  %v1558_v42 = vpop.f32.mrf.mxu3 }
  0xf1   :  { %1830 = vst.msk [vmem:[%s3459_s3 + $0x50] sm:$0xff] %vm1819_vm2, %v1780_v38  ;;  %v1149_v43 = vadd.f32 %v2532_v10, %v1148_v41  ;;  %v1559_v44 = vadd.f32 %v2532_v10, %v1558_v42  ;;  %v863_v47 = vmax.f32 %v404_v39, %v814_v40  ;;  %v2053_v39 = vld [vmem:[%s3457_s0 + $0x408] sm:$0xff]  ;;  %v2152_v40 = vld [vmem:[%s3457_s0 + $0x590] sm:$0xff] }
  0xf3   :  { %v1273_v48 = vmax.f32 %v1149_v43, 0.0  ;;  %v1683_v49 = vmax.f32 %v1559_v44, 0.0 }
  0xf4   :  { %v282_v50 = vpop.f32.mrf.mxu0  ;;  %v692_v51 = vpop.f32.mrf.mxu1 }
  0xf5   :  { %v1732_v54 = vmax.f32 %v1273_v48, %v1683_v49  ;;  %2100 = vmatmul.msk.f32.gmra.mxu2 %vm77_vm1, %v2050_v45  ;;  %2199 = vmatmul.msk.f32.gmra.mxu3 %vm77_vm1, %v2149_v46  ;;  %v283_v55 = vadd.f32 %v2532_v10, %v282_v50  ;;  %v693_v56 = vadd.f32 %v2532_v10, %v692_v51  ;;  %v56_v46 = vld [vmem:[%s3457_s0 + $0xf8] sm:$0xff] }
  0xf7   :  { %v1781_v57 = vmax.f32 %v863_v47, %v1732_v54  ;;  %v405_v58 = vmax.f32 %v283_v55, 0.0  ;;  %v815_v59 = vmax.f32 %v693_v56, 0.0  ;;  %1902 = vmatmul.msk.f32.gmra.mxu0 %vm77_vm1, %v53_v52  ;;  %2001 = vmatmul.msk.f32.gmra.mxu1 %vm77_vm1, %v1951_v53  ;;  %v1954_v47 = vld [vmem:[%s3457_s0 + $0x280] sm:$0xff] }
  0xf8   :  { %v1151_v60 = vpop.f32.mrf.mxu2  ;;  %v1561_v61 = vpop.f32.mrf.mxu3 }
  0xf9   :  { %1831 = vst.msk [vmem:[%s3459_s3 + $0x58] sm:$0xff] %vm1819_vm2, %v1781_v57  ;;  %v1152_v62 = vadd.f32 %v2532_v10, %v1151_v60  ;;  %v1562_v63 = vadd.f32 %v2532_v10, %v1561_v61  ;;  %v864_v2 = vmax.f32 %v405_v58, %v815_v59  ;;  %v2054_v58 = vld [vmem:[%s3457_s0 + $0x410] sm:$0xff]  ;;  %v2153_v59 = vld [vmem:[%s3457_s0 + $0x598] sm:$0xff] }
  0xfb   :  { %v1274_v3 = vmax.f32 %v1152_v62, 0.0  ;;  %v1684_v4 = vmax.f32 %v1562_v63, 0.0 }
  0xfc   :  { %v285_v5 = vpop.f32.mrf.mxu0  ;;  %v695_v6 = vpop.f32.mrf.mxu1 }
  0xfd   :  { %v1733_v9 = vmax.f32 %v1274_v3, %v1684_v4  ;;  %2101 = vmatmul.msk.f32.gmra.mxu2 %vm77_vm1, %v2051_v0  ;;  %2200 = vmatmul.msk.f32.gmra.mxu3 %vm77_vm1, %v2150_v1  ;;  %v286_v11 = vadd.f32 %v2532_v10, %v285_v5  ;;  %v696_v12 = vadd.f32 %v2532_v10, %v695_v6  ;;  %v57_v1 = vld [vmem:[%s3457_s0 + $0x100] sm:$0xff] }
  0xff   :  { %v1782_v13 = vmax.f32 %v864_v2, %v1733_v9  ;;  %v406_v14 = vmax.f32 %v286_v11, 0.0  ;;  %v816_v15 = vmax.f32 %v696_v12, 0.0  ;;  %1903 = vmatmul.msk.f32.gmra.mxu0 %vm77_vm1, %v54_v7  ;;  %2002 = vmatmul.msk.f32.gmra.mxu1 %vm77_vm1, %v1952_v8  ;;  %v1955_v2 = vld [vmem:[%s3457_s0 + $0x288] sm:$0xff] }
 0x100   :  { %v1154_v16 = vpop.f32.mrf.mxu2  ;;  %v1564_v17 = vpop.f32.mrf.mxu3 }
 0x101   :  { %1832 = vst.msk [vmem:[%s3459_s3 + $0x60] sm:$0xff] %vm1819_vm2, %v1782_v13  ;;  %v1155_v18 = vadd.f32 %v2532_v10, %v1154_v16  ;;  %v1565_v19 = vadd.f32 %v2532_v10, %v1564_v17  ;;  %v865_v22 = vmax.f32 %v406_v14, %v816_v15  ;;  %v2055_v14 = vld [vmem:[%s3457_s0 + $0x418] sm:$0xff]  ;;  %v2154_v15 = vld [vmem:[%s3457_s0 + $0x5a0] sm:$0xff] }
 0x103   :  { %v1275_v23 = vmax.f32 %v1155_v18, 0.0  ;;  %v1685_v24 = vmax.f32 %v1565_v19, 0.0 }
 0x104   :  { %v288_v25 = vpop.f32.mrf.mxu0  ;;  %v698_v26 = vpop.f32.mrf.mxu1 }
 0x105   :  { %v1734_v29 = vmax.f32 %v1275_v23, %v1685_v24  ;;  %2102 = vmatmul.msk.f32.gmra.mxu2 %vm77_vm1, %v2052_v20  ;;  %2201 = vmatmul.msk.f32.gmra.mxu3 %vm77_vm1, %v2151_v21  ;;  %v289_v30 = vadd.f32 %v2532_v10, %v288_v25  ;;  %v699_v31 = vadd.f32 %v2532_v10, %v698_v26  ;;  %v58_v21 = vld [vmem:[%s3457_s0 + $0x108] sm:$0xff] }
 0x107   :  { %v1783_v32 = vmax.f32 %v865_v22, %v1734_v29  ;;  %v407_v33 = vmax.f32 %v289_v30, 0.0  ;;  %v817_v34 = vmax.f32 %v699_v31, 0.0  ;;  %1904 = vmatmul.msk.f32.gmra.mxu0 %vm77_vm1, %v55_v27  ;;  %2003 = vmatmul.msk.f32.gmra.mxu1 %vm77_vm1, %v1953_v28  ;;  %v1956_v22 = vld [vmem:[%s3457_s0 + $0x290] sm:$0xff] }
 0x108   :  { %v1157_v35 = vpop.f32.mrf.mxu2  ;;  %v1567_v36 = vpop.f32.mrf.mxu3 }
 0x109   :  { %1833 = vst.msk [vmem:[%s3459_s3 + $0x68] sm:$0xff] %vm1819_vm2, %v1783_v32  ;;  %v1158_v37 = vadd.f32 %v2532_v10, %v1157_v35  ;;  %v1568_v38 = vadd.f32 %v2532_v10, %v1567_v36  ;;  %v866_v41 = vmax.f32 %v407_v33, %v817_v34  ;;  %v2056_v33 = vld [vmem:[%s3457_s0 + $0x420] sm:$0xff]  ;;  %v2155_v34 = vld [vmem:[%s3457_s0 + $0x5a8] sm:$0xff] }
 0x10b   :  { %v1276_v42 = vmax.f32 %v1158_v37, 0.0  ;;  %v1686_v43 = vmax.f32 %v1568_v38, 0.0 }
 0x10c   :  { %v291_v44 = vpop.f32.mrf.mxu0  ;;  %v701_v45 = vpop.f32.mrf.mxu1 }
 0x10d   :  { %v1735_v48 = vmax.f32 %v1276_v42, %v1686_v43  ;;  %2103 = vmatmul.msk.f32.gmra.mxu2 %vm77_vm1, %v2053_v39  ;;  %2202 = vmatmul.msk.f32.gmra.mxu3 %vm77_vm1, %v2152_v40  ;;  %v292_v49 = vadd.f32 %v2532_v10, %v291_v44  ;;  %v702_v50 = vadd.f32 %v2532_v10, %v701_v45  ;;  %v59_v40 = vld [vmem:[%s3457_s0 + $0x110] sm:$0xff] }
 0x10f   :  { %v1784_v51 = vmax.f32 %v866_v41, %v1735_v48  ;;  %v408_v52 = vmax.f32 %v292_v49, 0.0  ;;  %v818_v53 = vmax.f32 %v702_v50, 0.0  ;;  %1905 = vmatmul.msk.f32.gmra.mxu0 %vm77_vm1, %v56_v46  ;;  %2004 = vmatmul.msk.f32.gmra.mxu1 %vm77_vm1, %v1954_v47  ;;  %v1957_v41 = vld [vmem:[%s3457_s0 + $0x298] sm:$0xff] }
 0x110   :  { %v1160_v54 = vpop.f32.mrf.mxu2  ;;  %v1570_v55 = vpop.f32.mrf.mxu3 }
 0x111   :  { %1834 = vst.msk [vmem:[%s3459_s3 + $0x70] sm:$0xff] %vm1819_vm2, %v1784_v51  ;;  %v1161_v56 = vadd.f32 %v2532_v10, %v1160_v54  ;;  %v1571_v57 = vadd.f32 %v2532_v10, %v1570_v55  ;;  %v867_v60 = vmax.f32 %v408_v52, %v818_v53  ;;  %v2057_v52 = vld [vmem:[%s3457_s0 + $0x428] sm:$0xff]  ;;  %v2156_v53 = vld [vmem:[%s3457_s0 + $0x5b0] sm:$0xff] }
 0x113   :  { %v1277_v61 = vmax.f32 %v1161_v56, 0.0  ;;  %v1687_v62 = vmax.f32 %v1571_v57, 0.0 }
 0x114   :  { %v294_v63 = vpop.f32.mrf.mxu0  ;;  %v704_v0 = vpop.f32.mrf.mxu1 }
 0x115   :  { %v1736_v3 = vmax.f32 %v1277_v61, %v1687_v62  ;;  %2104 = vmatmul.msk.f32.gmra.mxu2 %vm77_vm1, %v2054_v58  ;;  %2203 = vmatmul.msk.f32.gmra.mxu3 %vm77_vm1, %v2153_v59  ;;  %v295_v4 = vadd.f32 %v2532_v10, %v294_v63  ;;  %v705_v5 = vadd.f32 %v2532_v10, %v704_v0  ;;  %v60_v59 = vld [vmem:[%s3457_s0 + $0x118] sm:$0xff] }
 0x117   :  { %v1785_v6 = vmax.f32 %v867_v60, %v1736_v3  ;;  %v409_v7 = vmax.f32 %v295_v4, 0.0  ;;  %v819_v8 = vmax.f32 %v705_v5, 0.0  ;;  %1906 = vmatmul.msk.f32.gmra.mxu0 %vm77_vm1, %v57_v1  ;;  %2005 = vmatmul.msk.f32.gmra.mxu1 %vm77_vm1, %v1955_v2  ;;  %v1958_v60 = vld [vmem:[%s3457_s0 + $0x2a0] sm:$0xff] }
 0x118   :  { %v1163_v9 = vpop.f32.mrf.mxu2  ;;  %v1573_v11 = vpop.f32.mrf.mxu3 }
 0x119   :  { %1835 = vst.msk [vmem:[%s3459_s3 + $0x78] sm:$0xff] %vm1819_vm2, %v1785_v6  ;;  %v1164_v12 = vadd.f32 %v2532_v10, %v1163_v9  ;;  %v1574_v13 = vadd.f32 %v2532_v10, %v1573_v11  ;;  %v868_v16 = vmax.f32 %v409_v7, %v819_v8  ;;  %v2058_v7 = vld [vmem:[%s3457_s0 + $0x430] sm:$0xff]  ;;  %v2157_v8 = vld [vmem:[%s3457_s0 + $0x5b8] sm:$0xff] }
 0x11b   :  { %v1278_v17 = vmax.f32 %v1164_v12, 0.0  ;;  %v1688_v18 = vmax.f32 %v1574_v13, 0.0 }
 0x11c   :  { %v297_v19 = vpop.f32.mrf.mxu0  ;;  %v707_v20 = vpop.f32.mrf.mxu1 }
 0x11d   :  { %v1737_v23 = vmax.f32 %v1278_v17, %v1688_v18  ;;  %2105 = vmatmul.msk.f32.gmra.mxu2 %vm77_vm1, %v2055_v14  ;;  %2204 = vmatmul.msk.f32.gmra.mxu3 %vm77_vm1, %v2154_v15  ;;  %v298_v24 = vadd.f32 %v2532_v10, %v297_v19  ;;  %v708_v25 = vadd.f32 %v2532_v10, %v707_v20  ;;  %v61_v15 = vld [vmem:[%s3457_s0 + $0x120] sm:$0xff] }
 0x11f   :  { %v1786_v26 = vmax.f32 %v868_v16, %v1737_v23  ;;  %v410_v27 = vmax.f32 %v298_v24, 0.0  ;;  %v820_v28 = vmax.f32 %v708_v25, 0.0  ;;  %1907 = vmatmul.msk.f32.gmra.mxu0 %vm77_vm1, %v58_v21  ;;  %2006 = vmatmul.msk.f32.gmra.mxu1 %vm77_vm1, %v1956_v22  ;;  %v1959_v16 = vld [vmem:[%s3457_s0 + $0x2a8] sm:$0xff] }
 0x120   :  { %v1166_v29 = vpop.f32.mrf.mxu2  ;;  %v1576_v30 = vpop.f32.mrf.mxu3 }
 0x121   :  { %1836 = vst.msk [vmem:[%s3459_s3 + $0x80] sm:$0xff] %vm1819_vm2, %v1786_v26  ;;  %v1167_v31 = vadd.f32 %v2532_v10, %v1166_v29  ;;  %v1577_v32 = vadd.f32 %v2532_v10, %v1576_v30  ;;  %v869_v35 = vmax.f32 %v410_v27, %v820_v28  ;;  %v2059_v27 = vld [vmem:[%s3457_s0 + $0x438] sm:$0xff]  ;;  %v2158_v28 = vld [vmem:[%s3457_s0 + $0x5c0] sm:$0xff] }
 0x123   :  { %v1279_v36 = vmax.f32 %v1167_v31, 0.0  ;;  %v1689_v37 = vmax.f32 %v1577_v32, 0.0 }
 0x124   :  { %v300_v38 = vpop.f32.mrf.mxu0  ;;  %v710_v39 = vpop.f32.mrf.mxu1 }
 0x125   :  { %v1738_v42 = vmax.f32 %v1279_v36, %v1689_v37  ;;  %2106 = vmatmul.msk.f32.gmra.mxu2 %vm77_vm1, %v2056_v33  ;;  %2205 = vmatmul.msk.f32.gmra.mxu3 %vm77_vm1, %v2155_v34  ;;  %v301_v43 = vadd.f32 %v2532_v10, %v300_v38  ;;  %v711_v44 = vadd.f32 %v2532_v10, %v710_v39  ;;  %v62_v34 = vld [vmem:[%s3457_s0 + $0x128] sm:$0xff]  ;;  %v3051_v36 = vld [vmem:[%s3458_s2] ss:$0 sm:$0xff] }
 0x127   :  { %v1787_v45 = vmax.f32 %v869_v35, %v1738_v42  ;;  %v411_v46 = vmax.f32 %v301_v43, 0.0  ;;  %v821_v47 = vmax.f32 %v711_v44, 0.0  ;;  %1908 = vmatmul.msk.f32.gmra.mxu0 %vm77_vm1, %v59_v40  ;;  %2007 = vmatmul.msk.f32.gmra.mxu1 %vm77_vm1, %v1957_v41 }
 0x128   :  { %v1169_v48 = vpop.f32.mrf.mxu2  ;;  %v1579_v49 = vpop.f32.mrf.mxu3 }
 0x129   :  { %1837 = vst.msk [vmem:[%s3459_s3 + $0x88] sm:$0xff] %vm1819_vm2, %v1787_v45  ;;  %v1170_v50 = vadd.f32 %v2532_v10, %v1169_v48  ;;  %v1580_v51 = vadd.f32 %v2532_v10, %v1579_v49  ;;  %v870_v54 = vmax.f32 %v411_v46, %v821_v47  ;;  %v2060_v46 = vld [vmem:[%s3457_s0 + $0x440] sm:$0xff]  ;;  %v2159_v47 = vld [vmem:[%s3457_s0 + $0x5c8] sm:$0xff] }
 0x12b   :  { %v1280_v55 = vmax.f32 %v1170_v50, 0.0  ;;  %v1690_v56 = vmax.f32 %v1580_v51, 0.0 }
 0x12c   :  { %v303_v57 = vpop.f32.mrf.mxu0  ;;  %v713_v58 = vpop.f32.mrf.mxu1 }
 0x12d   :  { %v1739_v61 = vmax.f32 %v1280_v55, %v1690_v56  ;;  %2107 = vmatmul.msk.f32.gmra.mxu2 %vm77_vm1, %v2057_v52  ;;  %2206 = vmatmul.msk.f32.gmra.mxu3 %vm77_vm1, %v2156_v53  ;;  %v304_v62 = vadd.f32 %v2532_v10, %v303_v57  ;;  %v714_v63 = vadd.f32 %v2532_v10, %v713_v58  ;;  %v63_v53 = vld [vmem:[%s3457_s0 + $0x130] sm:$0xff] }
 0x12f   :  { %v1788_v0 = vmax.f32 %v870_v54, %v1739_v61  ;;  %v412_v1 = vmax.f32 %v304_v62, 0.0  ;;  %v822_v2 = vmax.f32 %v714_v63, 0.0  ;;  %1909 = vmatmul.msk.f32.gmra.mxu0 %vm77_vm1, %v60_v59  ;;  %2008 = vmatmul.msk.f32.gmra.mxu1 %vm77_vm1, %v1958_v60  ;;  %v1961_v54 = vld [vmem:[%s3457_s0 + $0x2b8] sm:$0xff] }
 0x130   :  { %v1172_v3 = vpop.f32.mrf.mxu2  ;;  %v1582_v4 = vpop.f32.mrf.mxu3 }
 0x131   :  { %1838 = vst.msk [vmem:[%s3459_s3 + $0x90] sm:$0xff] %vm1819_vm2, %v1788_v0  ;;  %v1173_v5 = vadd.f32 %v2532_v10, %v1172_v3  ;;  %v1583_v6 = vadd.f32 %v2532_v10, %v1582_v4  ;;  %v871_v9 = vmax.f32 %v412_v1, %v822_v2  ;;  %v2061_v1 = vld [vmem:[%s3457_s0 + $0x448] sm:$0xff]  ;;  %v2160_v2 = vld [vmem:[%s3457_s0 + $0x5d0] sm:$0xff] }
 0x133   :  { %v1281_v11 = vmax.f32 %v1173_v5, 0.0  ;;  %v1691_v12 = vmax.f32 %v1583_v6, 0.0 }
 0x134   :  { %v306_v13 = vpop.f32.mrf.mxu0  ;;  %v716_v14 = vpop.f32.mrf.mxu1 }
 0x135   :  { %v1740_v17 = vmax.f32 %v1281_v11, %v1691_v12  ;;  %2108 = vmatmul.msk.f32.gmra.mxu2 %vm77_vm1, %v2058_v7  ;;  %2207 = vmatmul.msk.f32.gmra.mxu3 %vm77_vm1, %v2157_v8  ;;  %v307_v18 = vadd.f32 %v2532_v10, %v306_v13  ;;  %v717_v19 = vadd.f32 %v2532_v10, %v716_v14  ;;  %v64_v8 = vld [vmem:[%s3457_s0 + $0x138] sm:$0xff] }
 0x137   :  { %v1789_v20 = vmax.f32 %v871_v9, %v1740_v17  ;;  %v413_v21 = vmax.f32 %v307_v18, 0.0  ;;  %v823_v22 = vmax.f32 %v717_v19, 0.0  ;;  %1910 = vmatmul.msk.f32.gmra.mxu0 %vm77_vm1, %v61_v15  ;;  %2009 = vmatmul.msk.f32.gmra.mxu1 %vm77_vm1, %v1959_v16  ;;  %v1962_v9 = vld [vmem:[%s3457_s0 + $0x2c0] sm:$0xff] }
 0x138   :  { %v1175_v23 = vpop.f32.mrf.mxu2  ;;  %v1585_v24 = vpop.f32.mrf.mxu3 }
 0x139   :  { %1839 = vst.msk [vmem:[%s3459_s3 + $0x98] sm:$0xff] %vm1819_vm2, %v1789_v20  ;;  %v1176_v25 = vadd.f32 %v2532_v10, %v1175_v23  ;;  %v1586_v26 = vadd.f32 %v2532_v10, %v1585_v24  ;;  %v872_v29 = vmax.f32 %v413_v21, %v823_v22  ;;  %v1960_v10 = vld [vmem:[%s3457_s0 + $0x2b0] sm:$0xff]  ;;  %v2161_v22 = vld [vmem:[%s3457_s0 + $0x5d8] sm:$0xff] }
 0x13a   :  { %v2062_v21 = vld [vmem:[%s3457_s0 + $0x450] sm:$0xff] }
 0x13b   :  { %v1282_v30 = vmax.f32 %v1176_v25, 0.0  ;;  %v1692_v31 = vmax.f32 %v1586_v26, 0.0 }
 0x13c   :  { %v309_v32 = vpop.f32.mrf.mxu0  ;;  %v719_v33 = vpop.f32.mrf.mxu1 }
 0x13d   :  { %v1741_v35 = vmax.f32 %v1282_v30, %v1692_v31  ;;  %2109 = vmatmul.msk.f32.gmra.mxu2 %vm77_vm1, %v2059_v27  ;;  %2208 = vmatmul.msk.f32.gmra.mxu3 %vm77_vm1, %v2158_v28  ;;  %v310_v37 = vadd.f32 %v3051_v36, %v309_v32  ;;  %v720_v38 = vadd.f32 %v3051_v36, %v719_v33  ;;  %v65_v28 = vld [vmem:[%s3457_s0 + $0x140] sm:$0xff] }
 0x13f   :  { %v1790_v39 = vmax.f32 %v872_v29, %v1741_v35  ;;  %v414_v40 = vmax.f32 %v310_v37, 0.0  ;;  %v824_v41 = vmax.f32 %v720_v38, 0.0  ;;  %1911 = vmatmul.msk.f32.gmra.mxu0 %vm77_vm1, %v62_v34  ;;  %2010 = vmatmul.msk.f32.gmra.mxu1 %vm77_vm1, %v1960_v10  ;;  %v1963_v29 = vld [vmem:[%s3457_s0 + $0x2c8] sm:$0xff] }
 0x140   :  { %v1178_v42 = vpop.f32.mrf.mxu2  ;;  %v1588_v43 = vpop.f32.mrf.mxu3 }
 0x141   :  { %1840 = vst.msk [vmem:[%s3459_s3 + $0xa0] sm:$0xff] %vm1819_vm2, %v1790_v39  ;;  %v1179_v44 = vadd.f32 %v3051_v36, %v1178_v42  ;;  %v1589_v45 = vadd.f32 %v3051_v36, %v1588_v43  ;;  %v873_v48 = vmax.f32 %v414_v40, %v824_v41  ;;  %v2063_v40 = vld [vmem:[%s3457_s0 + $0x458] sm:$0xff]  ;;  %v2162_v41 = vld [vmem:[%s3457_s0 + $0x5e0] sm:$0xff] }
 0x143   :  { %v1283_v49 = vmax.f32 %v1179_v44, 0.0  ;;  %v1693_v50 = vmax.f32 %v1589_v45, 0.0 }
 0x144   :  { %v312_v51 = vpop.f32.mrf.mxu0  ;;  %v722_v52 = vpop.f32.mrf.mxu1 }
 0x145   :  { %v1742_v55 = vmax.f32 %v1283_v49, %v1693_v50  ;;  %2110 = vmatmul.msk.f32.gmra.mxu2 %vm77_vm1, %v2060_v46  ;;  %2209 = vmatmul.msk.f32.gmra.mxu3 %vm77_vm1, %v2159_v47  ;;  %v313_v56 = vadd.f32 %v3051_v36, %v312_v51  ;;  %v723_v57 = vadd.f32 %v3051_v36, %v722_v52  ;;  %v66_v47 = vld [vmem:[%s3457_s0 + $0x148] sm:$0xff] }
 0x147   :  { %v1791_v58 = vmax.f32 %v873_v48, %v1742_v55  ;;  %v415_v59 = vmax.f32 %v313_v56, 0.0  ;;  %v825_v60 = vmax.f32 %v723_v57, 0.0  ;;  %1912 = vmatmul.msk.f32.gmra.mxu0 %vm77_vm1, %v63_v53  ;;  %2011 = vmatmul.msk.f32.gmra.mxu1 %vm77_vm1, %v1961_v54  ;;  %v1964_v48 = vld [vmem:[%s3457_s0 + $0x2d0] sm:$0xff] }
 0x148   :  { %v1181_v61 = vpop.f32.mrf.mxu2  ;;  %v1591_v62 = vpop.f32.mrf.mxu3 }
 0x149   :  { %1841 = vst.msk [vmem:[%s3459_s3 + $0xa8] sm:$0xff] %vm1819_vm2, %v1791_v58  ;;  %v1182_v63 = vadd.f32 %v3051_v36, %v1181_v61  ;;  %v1592_v0 = vadd.f32 %v3051_v36, %v1591_v62  ;;  %v874_v3 = vmax.f32 %v415_v59, %v825_v60  ;;  %v2064_v59 = vld [vmem:[%s3457_s0 + $0x460] sm:$0xff]  ;;  %v2163_v60 = vld [vmem:[%s3457_s0 + $0x5e8] sm:$0xff] }
 0x14b   :  { %v1284_v4 = vmax.f32 %v1182_v63, 0.0  ;;  %v1694_v5 = vmax.f32 %v1592_v0, 0.0 }
 0x14c   :  { %v315_v6 = vpop.f32.mrf.mxu0  ;;  %v725_v7 = vpop.f32.mrf.mxu1 }
 0x14d   :  { %v1743_v11 = vmax.f32 %v1284_v4, %v1694_v5  ;;  %2111 = vmatmul.msk.f32.gmra.mxu2 %vm77_vm1, %v2061_v1  ;;  %2210 = vmatmul.msk.f32.gmra.mxu3 %vm77_vm1, %v2160_v2  ;;  %v316_v12 = vadd.f32 %v3051_v36, %v315_v6  ;;  %v726_v13 = vadd.f32 %v3051_v36, %v725_v7  ;;  %v67_v2 = vld [vmem:[%s3457_s0 + $0x150] sm:$0xff] }
 0x14f   :  { %v1792_v14 = vmax.f32 %v874_v3, %v1743_v11  ;;  %v416_v15 = vmax.f32 %v316_v12, 0.0  ;;  %v826_v16 = vmax.f32 %v726_v13, 0.0  ;;  %1913 = vmatmul.msk.f32.gmra.mxu0 %vm77_vm1, %v64_v8  ;;  %2012 = vmatmul.msk.f32.gmra.mxu1 %vm77_vm1, %v1962_v9  ;;  %v1965_v3 = vld [vmem:[%s3457_s0 + $0x2d8] sm:$0xff] }
 0x150   :  { %v1184_v17 = vpop.f32.mrf.mxu2  ;;  %v1594_v18 = vpop.f32.mrf.mxu3 }
 0x151   :  { %1842 = vst.msk [vmem:[%s3459_s3 + $0xb0] sm:$0xff] %vm1819_vm2, %v1792_v14  ;;  %v1185_v19 = vadd.f32 %v3051_v36, %v1184_v17  ;;  %v1595_v20 = vadd.f32 %v3051_v36, %v1594_v18  ;;  %v875_v23 = vmax.f32 %v416_v15, %v826_v16  ;;  %v2065_v15 = vld [vmem:[%s3457_s0 + $0x468] sm:$0xff]  ;;  %v2164_v16 = vld [vmem:[%s3457_s0 + $0x5f0] sm:$0xff] }
 0x153   :  { %v1285_v24 = vmax.f32 %v1185_v19, 0.0  ;;  %v1695_v25 = vmax.f32 %v1595_v20, 0.0 }
 0x154   :  { %v318_v26 = vpop.f32.mrf.mxu0  ;;  %v728_v27 = vpop.f32.mrf.mxu1 }
 0x155   :  { %v1744_v30 = vmax.f32 %v1285_v24, %v1695_v25  ;;  %2112 = vmatmul.msk.f32.gmra.mxu2 %vm77_vm1, %v2062_v21  ;;  %2211 = vmatmul.msk.f32.gmra.mxu3 %vm77_vm1, %v2161_v22  ;;  %v319_v31 = vadd.f32 %v3051_v36, %v318_v26  ;;  %v729_v32 = vadd.f32 %v3051_v36, %v728_v27  ;;  %v68_v22 = vld [vmem:[%s3457_s0 + $0x158] sm:$0xff] }
 0x157   :  { %v1793_v33 = vmax.f32 %v875_v23, %v1744_v30  ;;  %v417_v34 = vmax.f32 %v319_v31, 0.0  ;;  %v827_v10 = vmax.f32 %v729_v32, 0.0  ;;  %1914 = vmatmul.msk.f32.gmra.mxu0 %vm77_vm1, %v65_v28  ;;  %2013 = vmatmul.msk.f32.gmra.mxu1 %vm77_vm1, %v1963_v29  ;;  %v1966_v23 = vld [vmem:[%s3457_s0 + $0x2e0] sm:$0xff] }
 0x158   :  { %v1187_v35 = vpop.f32.mrf.mxu2  ;;  %v1597_v37 = vpop.f32.mrf.mxu3 }
 0x159   :  { %1843 = vst.msk [vmem:[%s3459_s3 + $0xb8] sm:$0xff] %vm1819_vm2, %v1793_v33  ;;  %v1188_v38 = vadd.f32 %v3051_v36, %v1187_v35  ;;  %v1598_v39 = vadd.f32 %v3051_v36, %v1597_v37  ;;  %v876_v42 = vmax.f32 %v417_v34, %v827_v10  ;;  %v2066_v34 = vld [vmem:[%s3457_s0 + $0x470] sm:$0xff]  ;;  %v2165_v10 = vld [vmem:[%s3457_s0 + $0x5f8] sm:$0xff] }
 0x15b   :  { %v1286_v43 = vmax.f32 %v1188_v38, 0.0  ;;  %v1696_v44 = vmax.f32 %v1598_v39, 0.0 }
 0x15c   :  { %v321_v45 = vpop.f32.mrf.mxu0  ;;  %v731_v46 = vpop.f32.mrf.mxu1 }
 0x15d   :  { %v1745_v49 = vmax.f32 %v1286_v43, %v1696_v44  ;;  %2113 = vmatmul.msk.f32.gmra.mxu2 %vm77_vm1, %v2063_v40  ;;  %2212 = vmatmul.msk.f32.gmra.mxu3 %vm77_vm1, %v2162_v41  ;;  %v322_v50 = vadd.f32 %v3051_v36, %v321_v45  ;;  %v732_v51 = vadd.f32 %v3051_v36, %v731_v46  ;;  %v69_v41 = vld [vmem:[%s3457_s0 + $0x160] sm:$0xff] }
 0x15f   :  { %v1794_v52 = vmax.f32 %v876_v42, %v1745_v49  ;;  %v418_v53 = vmax.f32 %v322_v50, 0.0  ;;  %v828_v54 = vmax.f32 %v732_v51, 0.0  ;;  %1915 = vmatmul.msk.f32.gmra.mxu0 %vm77_vm1, %v66_v47  ;;  %2014 = vmatmul.msk.f32.gmra.mxu1 %vm77_vm1, %v1964_v48  ;;  %v1967_v42 = vld [vmem:[%s3457_s0 + $0x2e8] sm:$0xff] }
 0x160   :  { %v1190_v55 = vpop.f32.mrf.mxu2  ;;  %v1600_v56 = vpop.f32.mrf.mxu3 }
 0x161   :  { %1844 = vst.msk [vmem:[%s3459_s3 + $0xc0] sm:$0xff] %vm1819_vm2, %v1794_v52  ;;  %v1191_v57 = vadd.f32 %v3051_v36, %v1190_v55  ;;  %v1601_v58 = vadd.f32 %v3051_v36, %v1600_v56  ;;  %v877_v61 = vmax.f32 %v418_v53, %v828_v54  ;;  %v2067_v53 = vld [vmem:[%s3457_s0 + $0x478] sm:$0xff]  ;;  %v2166_v54 = vld [vmem:[%s3457_s0 + $0x600] sm:$0xff] }
 0x163   :  { %v1287_v62 = vmax.f32 %v1191_v57, 0.0  ;;  %v1697_v63 = vmax.f32 %v1601_v58, 0.0 }
 0x164   :  { %v324_v0 = vpop.f32.mrf.mxu0  ;;  %v734_v1 = vpop.f32.mrf.mxu1 }
 0x165   :  { %v1746_v4 = vmax.f32 %v1287_v62, %v1697_v63  ;;  %2114 = vmatmul.msk.f32.gmra.mxu2 %vm77_vm1, %v2064_v59  ;;  %2213 = vmatmul.msk.f32.gmra.mxu3 %vm77_vm1, %v2163_v60  ;;  %v325_v5 = vadd.f32 %v3051_v36, %v324_v0  ;;  %v735_v6 = vadd.f32 %v3051_v36, %v734_v1  ;;  %v70_v60 = vld [vmem:[%s3457_s0 + $0x168] sm:$0xff] }
 0x167   :  { %v1795_v7 = vmax.f32 %v877_v61, %v1746_v4  ;;  %v419_v8 = vmax.f32 %v325_v5, 0.0  ;;  %v829_v9 = vmax.f32 %v735_v6, 0.0  ;;  %1916 = vmatmul.msk.f32.gmra.mxu0 %vm77_vm1, %v67_v2  ;;  %2015 = vmatmul.msk.f32.gmra.mxu1 %vm77_vm1, %v1965_v3  ;;  %v1968_v61 = vld [vmem:[%s3457_s0 + $0x2f0] sm:$0xff] }
 0x168   :  { %v1193_v11 = vpop.f32.mrf.mxu2  ;;  %v1603_v12 = vpop.f32.mrf.mxu3 }
 0x169   :  { %1845 = vst.msk [vmem:[%s3459_s3 + $0xc8] sm:$0xff] %vm1819_vm2, %v1795_v7  ;;  %v1194_v13 = vadd.f32 %v3051_v36, %v1193_v11  ;;  %v1604_v14 = vadd.f32 %v3051_v36, %v1603_v12  ;;  %v878_v17 = vmax.f32 %v419_v8, %v829_v9  ;;  %v2068_v8 = vld [vmem:[%s3457_s0 + $0x480] sm:$0xff]  ;;  %v2167_v9 = vld [vmem:[%s3457_s0 + $0x608] sm:$0xff] }
 0x16b   :  { %v1288_v18 = vmax.f32 %v1194_v13, 0.0  ;;  %v1698_v19 = vmax.f32 %v1604_v14, 0.0 }
 0x16c   :  { %v327_v20 = vpop.f32.mrf.mxu0  ;;  %v737_v21 = vpop.f32.mrf.mxu1 }
 0x16d   :  { %v1747_v24 = vmax.f32 %v1288_v18, %v1698_v19  ;;  %2115 = vmatmul.msk.f32.gmra.mxu2 %vm77_vm1, %v2065_v15  ;;  %2214 = vmatmul.msk.f32.gmra.mxu3 %vm77_vm1, %v2164_v16  ;;  %v328_v25 = vadd.f32 %v3051_v36, %v327_v20  ;;  %v738_v26 = vadd.f32 %v3051_v36, %v737_v21  ;;  %v71_v16 = vld [vmem:[%s3457_s0 + $0x170] sm:$0xff] }
 0x16f   :  { %v1796_v27 = vmax.f32 %v878_v17, %v1747_v24  ;;  %v420_v28 = vmax.f32 %v328_v25, 0.0  ;;  %v830_v29 = vmax.f32 %v738_v26, 0.0  ;;  %1917 = vmatmul.msk.f32.gmra.mxu0 %vm77_vm1, %v68_v22  ;;  %2016 = vmatmul.msk.f32.gmra.mxu1 %vm77_vm1, %v1966_v23  ;;  %v1969_v17 = vld [vmem:[%s3457_s0 + $0x2f8] sm:$0xff] }
 0x170   :  { %v1196_v30 = vpop.f32.mrf.mxu2  ;;  %v1606_v31 = vpop.f32.mrf.mxu3 }
 0x171   :  { %1846 = vst.msk [vmem:[%s3459_s3 + $0xd0] sm:$0xff] %vm1819_vm2, %v1796_v27  ;;  %v1197_v32 = vadd.f32 %v3051_v36, %v1196_v30  ;;  %v1607_v33 = vadd.f32 %v3051_v36, %v1606_v31  ;;  %v879_v35 = vmax.f32 %v420_v28, %v830_v29  ;;  %v2069_v28 = vld [vmem:[%s3457_s0 + $0x488] sm:$0xff]  ;;  %v2168_v29 = vld [vmem:[%s3457_s0 + $0x610] sm:$0xff] }
 0x173   :  { %v1289_v37 = vmax.f32 %v1197_v32, 0.0  ;;  %v1699_v38 = vmax.f32 %v1607_v33, 0.0 }
 0x174   :  { %v330_v39 = vpop.f32.mrf.mxu0  ;;  %v740_v40 = vpop.f32.mrf.mxu1 }
 0x175   :  { %v1748_v43 = vmax.f32 %v1289_v37, %v1699_v38  ;;  %2116 = vmatmul.msk.f32.gmra.mxu2 %vm77_vm1, %v2066_v34  ;;  %2215 = vmatmul.msk.f32.gmra.mxu3 %vm77_vm1, %v2165_v10  ;;  %v331_v44 = vadd.f32 %v3051_v36, %v330_v39  ;;  %v741_v45 = vadd.f32 %v3051_v36, %v740_v40  ;;  %v72_v10 = vld [vmem:[%s3457_s0 + $0x178] sm:$0xff] }
 0x177   :  { %v1797_v46 = vmax.f32 %v879_v35, %v1748_v43  ;;  %v421_v47 = vmax.f32 %v331_v44, 0.0  ;;  %v831_v48 = vmax.f32 %v741_v45, 0.0  ;;  %1918 = vmatmul.msk.f32.gmra.mxu0 %vm77_vm1, %v69_v41  ;;  %2017 = vmatmul.msk.f32.gmra.mxu1 %vm77_vm1, %v1967_v42  ;;  %v1970_v35 = vld [vmem:[%s3457_s0 + $0x300] sm:$0xff] }
 0x178   :  { %v1199_v49 = vpop.f32.mrf.mxu2  ;;  %v1609_v50 = vpop.f32.mrf.mxu3 }
 0x179   :  { %1847 = vst.msk [vmem:[%s3459_s3 + $0xd8] sm:$0xff] %vm1819_vm2, %v1797_v46  ;;  %v1200_v51 = vadd.f32 %v3051_v36, %v1199_v49  ;;  %v1610_v52 = vadd.f32 %v3051_v36, %v1609_v50  ;;  %v880_v55 = vmax.f32 %v421_v47, %v831_v48  ;;  %v2070_v47 = vld [vmem:[%s3457_s0 + $0x490] sm:$0xff]  ;;  %v2169_v48 = vld [vmem:[%s3457_s0 + $0x618] sm:$0xff] }
 0x17b   :  { %v1290_v56 = vmax.f32 %v1200_v51, 0.0  ;;  %v1700_v57 = vmax.f32 %v1610_v52, 0.0 }
 0x17c   :  { %v333_v58 = vpop.f32.mrf.mxu0  ;;  %v743_v59 = vpop.f32.mrf.mxu1 }
 0x17d   :  { %v1749_v62 = vmax.f32 %v1290_v56, %v1700_v57  ;;  %2117 = vmatmul.msk.f32.gmra.mxu2 %vm77_vm1, %v2067_v53  ;;  %2216 = vmatmul.msk.f32.gmra.mxu3 %vm77_vm1, %v2166_v54  ;;  %v334_v63 = vadd.f32 %v3051_v36, %v333_v58  ;;  %v744_v0 = vadd.f32 %v3051_v36, %v743_v59  ;;  %v73_v54 = vld [vmem:[%s3457_s0 + $0x180] sm:$0xff] }
 0x17f   :  { %v1798_v1 = vmax.f32 %v880_v55, %v1749_v62  ;;  %v422_v2 = vmax.f32 %v334_v63, 0.0  ;;  %v832_v3 = vmax.f32 %v744_v0, 0.0  ;;  %1919 = vmatmul.msk.f32.gmra.mxu0 %vm77_vm1, %v70_v60  ;;  %2018 = vmatmul.msk.f32.gmra.mxu1 %vm77_vm1, %v1968_v61  ;;  %v1971_v55 = vld [vmem:[%s3457_s0 + $0x308] sm:$0xff] }
 0x180   :  { %v1202_v4 = vpop.f32.mrf.mxu2  ;;  %v1612_v5 = vpop.f32.mrf.mxu3 }
 0x181   :  { %1848 = vst.msk [vmem:[%s3459_s3 + $0xe0] sm:$0xff] %vm1819_vm2, %v1798_v1  ;;  %v1203_v6 = vadd.f32 %v3051_v36, %v1202_v4  ;;  %v1613_v7 = vadd.f32 %v3051_v36, %v1612_v5  ;;  %v881_v11 = vmax.f32 %v422_v2, %v832_v3 }
 0x183   :  { %v1291_v12 = vmax.f32 %v1203_v6, 0.0  ;;  %v1701_v13 = vmax.f32 %v1613_v7, 0.0 }
 0x184   :  { %v336_v14 = vpop.f32.mrf.mxu0  ;;  %v746_v15 = vpop.f32.mrf.mxu1 }
 0x185   :  { %v1750_v18 = vmax.f32 %v1291_v12, %v1701_v13  ;;  %2118 = vmatmul.msk.f32.gmra.mxu2 %vm77_vm1, %v2068_v8  ;;  %2217 = vmatmul.msk.f32.gmra.mxu3 %vm77_vm1, %v2167_v9  ;;  %v337_v19 = vadd.f32 %v3051_v36, %v336_v14  ;;  %v747_v20 = vadd.f32 %v3051_v36, %v746_v15 }
 0x187   :  { %v1799_v21 = vmax.f32 %v881_v11, %v1750_v18  ;;  %v423_v22 = vmax.f32 %v337_v19, 0.0  ;;  %v833_v23 = vmax.f32 %v747_v20, 0.0  ;;  %1920 = vmatmul.msk.f32.gmra.mxu0 %vm77_vm1, %v71_v16  ;;  %2019 = vmatmul.msk.f32.gmra.mxu1 %vm77_vm1, %v1969_v17 }
 0x188   :  { %v1205_v24 = vpop.f32.mrf.mxu2  ;;  %v1615_v25 = vpop.f32.mrf.mxu3 }
 0x189   :  { %1849 = vst.msk [vmem:[%s3459_s3 + $0xe8] sm:$0xff] %vm1819_vm2, %v1799_v21  ;;  %v1206_v26 = vadd.f32 %v3051_v36, %v1205_v24  ;;  %v1616_v27 = vadd.f32 %v3051_v36, %v1615_v25  ;;  %v882_v30 = vmax.f32 %v423_v22, %v833_v23 }
 0x18b   :  { %v1292_v31 = vmax.f32 %v1206_v26, 0.0  ;;  %v1702_v32 = vmax.f32 %v1616_v27, 0.0 }
 0x18c   :  { %v339_v33 = vpop.f32.mrf.mxu0  ;;  %v749_v34 = vpop.f32.mrf.mxu1 }
 0x18d   :  { %v1751_v37 = vmax.f32 %v1292_v31, %v1702_v32  ;;  %2119 = vmatmul.msk.f32.gmra.mxu2 %vm77_vm1, %v2069_v28  ;;  %2218 = vmatmul.msk.f32.gmra.mxu3 %vm77_vm1, %v2168_v29  ;;  %v340_v38 = vadd.f32 %v3051_v36, %v339_v33  ;;  %v750_v39 = vadd.f32 %v3051_v36, %v749_v34 }
 0x18f   :  { %v1800_v40 = vmax.f32 %v882_v30, %v1751_v37  ;;  %v424_v41 = vmax.f32 %v340_v38, 0.0  ;;  %v834_v42 = vmax.f32 %v750_v39, 0.0  ;;  %1921 = vmatmul.msk.f32.gmra.mxu0 %vm77_vm1, %v72_v10  ;;  %2020 = vmatmul.msk.f32.gmra.mxu1 %vm77_vm1, %v1970_v35 }
 0x190   :  { %v1208_v43 = vpop.f32.mrf.mxu2  ;;  %v1618_v44 = vpop.f32.mrf.mxu3 }
 0x191   :  { %1850 = vst.msk [vmem:[%s3459_s3 + $0xf0] sm:$0xff] %vm1819_vm2, %v1800_v40  ;;  %v1209_v45 = vadd.f32 %v3051_v36, %v1208_v43  ;;  %v1619_v46 = vadd.f32 %v3051_v36, %v1618_v44  ;;  %v883_v49 = vmax.f32 %v424_v41, %v834_v42 }
 0x193   :  { %v1293_v50 = vmax.f32 %v1209_v45, 0.0  ;;  %v1703_v51 = vmax.f32 %v1619_v46, 0.0 }
 0x194   :  { %v342_v52 = vpop.f32.mrf.mxu0  ;;  %v752_v53 = vpop.f32.mrf.mxu1 }
 0x195   :  { %v1752_v56 = vmax.f32 %v1293_v50, %v1703_v51  ;;  %2120 = vmatmul.msk.f32.gmra.mxu2 %vm77_vm1, %v2070_v47  ;;  %2219 = vmatmul.msk.f32.gmra.mxu3 %vm77_vm1, %v2169_v48  ;;  %v343_v57 = vadd.f32 %v3051_v36, %v342_v52  ;;  %v753_v58 = vadd.f32 %v3051_v36, %v752_v53 }
 0x197   :  { %v1801_v59 = vmax.f32 %v883_v49, %v1752_v56  ;;  %v425_v60 = vmax.f32 %v343_v57, 0.0  ;;  %v835_v61 = vmax.f32 %v753_v58, 0.0  ;;  %1922 = vmatmul.msk.f32.gmra.mxu0 %vm77_vm1, %v73_v54  ;;  %2021 = vmatmul.msk.f32.gmra.mxu1 %vm77_vm1, %v1971_v55 }
 0x198   :  { %v1211_v62 = vpop.f32.mrf.mxu2  ;;  %v1621_v63 = vpop.f32.mrf.mxu3 }
 0x199   :  { %1851 = vst.msk [vmem:[%s3459_s3 + $0xf8] sm:$0xff] %vm1819_vm2, %v1801_v59  ;;  %v1212_v0 = vadd.f32 %v3051_v36, %v1211_v62  ;;  %v1622_v1 = vadd.f32 %v3051_v36, %v1621_v63  ;;  %v884_v2 = vmax.f32 %v425_v60, %v835_v61 }
 0x19b   :  { %v1294_v3 = vmax.f32 %v1212_v0, 0.0  ;;  %v1704_v4 = vmax.f32 %v1622_v1, 0.0 }
 0x19c   :  { %v345_v5 = vpop.f32.mrf.mxu0  ;;  %v755_v6 = vpop.f32.mrf.mxu1 }
 0x19d   :  { %v1753_v7 = vmax.f32 %v1294_v3, %v1704_v4  ;;  %v346_v8 = vadd.f32 %v3051_v36, %v345_v5  ;;  %v756_v9 = vadd.f32 %v3051_v36, %v755_v6 }
 0x19f   :  { %v1802_v11 = vmax.f32 %v884_v2, %v1753_v7  ;;  %v426_v12 = vmax.f32 %v346_v8, 0.0  ;;  %v836_v13 = vmax.f32 %v756_v9, 0.0 }
 0x1a0   :  { %v1214_v14 = vpop.f32.mrf.mxu2  ;;  %v1624_v15 = vpop.f32.mrf.mxu3 }
 0x1a1   :  { %1852 = vst.msk [vmem:[%s3459_s3 + $0x100] sm:$0xff] %vm1819_vm2, %v1802_v11  ;;  %v1215_v16 = vadd.f32 %v3051_v36, %v1214_v14  ;;  %v1625_v17 = vadd.f32 %v3051_v36, %v1624_v15  ;;  %v885_v18 = vmax.f32 %v426_v12, %v836_v13 }
 0x1a3   :  { %v1295_v19 = vmax.f32 %v1215_v16, 0.0  ;;  %v1705_v20 = vmax.f32 %v1625_v17, 0.0 }
 0x1a4   :  { %v348_v21 = vpop.f32.mrf.mxu0  ;;  %v758_v22 = vpop.f32.mrf.mxu1 }
 0x1a5   :  { %v1754_v23 = vmax.f32 %v1295_v19, %v1705_v20  ;;  %v349_v24 = vadd.f32 %v3051_v36, %v348_v21  ;;  %v759_v25 = vadd.f32 %v3051_v36, %v758_v22 }
 0x1a7   :  { %v1803_v26 = vmax.f32 %v885_v18, %v1754_v23  ;;  %v427_v27 = vmax.f32 %v349_v24, 0.0  ;;  %v837_v28 = vmax.f32 %v759_v25, 0.0 }
 0x1a8   :  { %v1217_v29 = vpop.f32.mrf.mxu2  ;;  %v1627_v30 = vpop.f32.mrf.mxu3 }
 0x1a9   :  { %1853 = vst.msk [vmem:[%s3459_s3 + $0x108] sm:$0xff] %vm1819_vm2, %v1803_v26  ;;  %v1218_v31 = vadd.f32 %v3051_v36, %v1217_v29  ;;  %v1628_v32 = vadd.f32 %v3051_v36, %v1627_v30  ;;  %v886_v33 = vmax.f32 %v427_v27, %v837_v28 }
 0x1ab   :  { %v1296_v34 = vmax.f32 %v1218_v31, 0.0  ;;  %v1706_v10 = vmax.f32 %v1628_v32, 0.0 }
 0x1ac   :  { %v351_v35 = vpop.f32.mrf.mxu0  ;;  %v761_v37 = vpop.f32.mrf.mxu1 }
 0x1ad   :  { %v1755_v38 = vmax.f32 %v1296_v34, %v1706_v10  ;;  %v352_v39 = vadd.f32 %v3051_v36, %v351_v35  ;;  %v762_v40 = vadd.f32 %v3051_v36, %v761_v37 }
 0x1af   :  { %v1804_v41 = vmax.f32 %v886_v33, %v1755_v38  ;;  %v428_v42 = vmax.f32 %v352_v39, 0.0  ;;  %v838_v43 = vmax.f32 %v762_v40, 0.0 }
 0x1b0   :  { %v1220_v44 = vpop.f32.mrf.mxu2  ;;  %v1630_v45 = vpop.f32.mrf.mxu3 }
 0x1b1   :  { %1854 = vst.msk [vmem:[%s3459_s3 + $0x110] sm:$0xff] %vm1819_vm2, %v1804_v41  ;;  %v1221_v46 = vadd.f32 %v3051_v36, %v1220_v44  ;;  %v1631_v47 = vadd.f32 %v3051_v36, %v1630_v45  ;;  %v887_v48 = vmax.f32 %v428_v42, %v838_v43 }
 0x1b3   :  { %v1297_v49 = vmax.f32 %v1221_v46, 0.0  ;;  %v1707_v50 = vmax.f32 %v1631_v47, 0.0 }
 0x1b4   :  { %v354_v51 = vpop.f32.mrf.mxu0  ;;  %v764_v52 = vpop.f32.mrf.mxu1 }
 0x1b5   :  { %v1756_v53 = vmax.f32 %v1297_v49, %v1707_v50  ;;  %v355_v54 = vadd.f32 %v3051_v36, %v354_v51  ;;  %v765_v55 = vadd.f32 %v3051_v36, %v764_v52 }
 0x1b7   :  { %v1805_v56 = vmax.f32 %v887_v48, %v1756_v53  ;;  %v429_v57 = vmax.f32 %v355_v54, 0.0  ;;  %v839_v58 = vmax.f32 %v765_v55, 0.0 }
 0x1b8   :  { %v1223_v59 = vpop.f32.mrf.mxu2  ;;  %v1633_v60 = vpop.f32.mrf.mxu3 }
 0x1b9   :  { %1855 = vst.msk [vmem:[%s3459_s3 + $0x118] sm:$0xff] %vm1819_vm2, %v1805_v56  ;;  %v1224_v61 = vadd.f32 %v3051_v36, %v1223_v59  ;;  %v1634_v62 = vadd.f32 %v3051_v36, %v1633_v60  ;;  %v888_v63 = vmax.f32 %v429_v57, %v839_v58 }
 0x1bb   :  { %v1298_v0 = vmax.f32 %v1224_v61, 0.0  ;;  %v1708_v1 = vmax.f32 %v1634_v62, 0.0 }
 0x1bc   :  { %v357_v2 = vpop.f32.mrf.mxu0  ;;  %v767_v3 = vpop.f32.mrf.mxu1 }
 0x1bd   :  { %v1757_v4 = vmax.f32 %v1298_v0, %v1708_v1  ;;  %v358_v5 = vadd.f32 %v3051_v36, %v357_v2  ;;  %v768_v6 = vadd.f32 %v3051_v36, %v767_v3 }
 0x1bf   :  { %v1806_v7 = vmax.f32 %v888_v63, %v1757_v4  ;;  %v430_v8 = vmax.f32 %v358_v5, 0.0  ;;  %v840_v9 = vmax.f32 %v768_v6, 0.0 }
 0x1c0   :  { %v1226_v11 = vpop.f32.mrf.mxu2  ;;  %v1636_v12 = vpop.f32.mrf.mxu3 }
 0x1c1   :  { %1856 = vst.msk [vmem:[%s3459_s3 + $0x120] sm:$0xff] %vm1819_vm2, %v1806_v7  ;;  %v1227_v13 = vadd.f32 %v3051_v36, %v1226_v11  ;;  %v1637_v14 = vadd.f32 %v3051_v36, %v1636_v12  ;;  %v889_v15 = vmax.f32 %v430_v8, %v840_v9 }
 0x1c3   :  { %v1299_v16 = vmax.f32 %v1227_v13, 0.0  ;;  %v1709_v17 = vmax.f32 %v1637_v14, 0.0 }
 0x1c4   :  { %v360_v18 = vpop.f32.mrf.mxu0  ;;  %v770_v19 = vpop.f32.mrf.mxu1 }
 0x1c5   :  { %v1758_v20 = vmax.f32 %v1299_v16, %v1709_v17  ;;  %v361_v21 = vadd.f32 %v3051_v36, %v360_v18  ;;  %v771_v22 = vadd.f32 %v3051_v36, %v770_v19 }
 0x1c7   :  { %v1807_v23 = vmax.f32 %v889_v15, %v1758_v20  ;;  %v431_v24 = vmax.f32 %v361_v21, 0.0  ;;  %v841_v25 = vmax.f32 %v771_v22, 0.0 }
 0x1c8   :  { %v1229_v26 = vpop.f32.mrf.mxu2  ;;  %v1639_v27 = vpop.f32.mrf.mxu3 }
 0x1c9   :  { %1857 = vst.msk [vmem:[%s3459_s3 + $0x128] sm:$0xff] %vm1819_vm2, %v1807_v23  ;;  %v1230_v28 = vadd.f32 %v3051_v36, %v1229_v26  ;;  %v1640_v29 = vadd.f32 %v3051_v36, %v1639_v27  ;;  %v890_v30 = vmax.f32 %v431_v24, %v841_v25 }
 0x1cb   :  { %v1300_v31 = vmax.f32 %v1230_v28, 0.0  ;;  %v1710_v32 = vmax.f32 %v1640_v29, 0.0 }
 0x1cc   :  { %v363_v33 = vpop.f32.mrf.mxu0  ;;  %v773_v34 = vpop.f32.mrf.mxu1 }
 0x1cd   :  { %v1759_v10 = vmax.f32 %v1300_v31, %v1710_v32  ;;  %v364_v35 = vadd.f32 %v3051_v36, %v363_v33  ;;  %v774_v37 = vadd.f32 %v3051_v36, %v773_v34 }
 0x1cf   :  { %v1808_v38 = vmax.f32 %v890_v30, %v1759_v10  ;;  %v432_v39 = vmax.f32 %v364_v35, 0.0  ;;  %v842_v40 = vmax.f32 %v774_v37, 0.0 }
 0x1d0   :  { %v1232_v41 = vpop.f32.mrf.mxu2  ;;  %v1642_v42 = vpop.f32.mrf.mxu3 }
 0x1d1   :  { %1858 = vst.msk [vmem:[%s3459_s3 + $0x130] sm:$0xff] %vm1819_vm2, %v1808_v38  ;;  %v1233_v43 = vadd.f32 %v3051_v36, %v1232_v41  ;;  %v1643_v44 = vadd.f32 %v3051_v36, %v1642_v42  ;;  %v891_v45 = vmax.f32 %v432_v39, %v842_v40 }
 0x1d3   :  { %v1301_v46 = vmax.f32 %v1233_v43, 0.0  ;;  %v1711_v47 = vmax.f32 %v1643_v44, 0.0 }
 0x1d4   :  { %v366_v48 = vpop.f32.mrf.mxu0  ;;  %v776_v49 = vpop.f32.mrf.mxu1 }
 0x1d5   :  { %v1760_v50 = vmax.f32 %v1301_v46, %v1711_v47  ;;  %v367_v51 = vadd.f32 %v3051_v36, %v366_v48  ;;  %v777_v52 = vadd.f32 %v3051_v36, %v776_v49 }
 0x1d7   :  { %v1809_v53 = vmax.f32 %v891_v45, %v1760_v50  ;;  %v433_v54 = vmax.f32 %v367_v51, 0.0  ;;  %v843_v55 = vmax.f32 %v777_v52, 0.0 }
 0x1d8   :  { %v1235_v56 = vpop.f32.mrf.mxu2  ;;  %v1645_v57 = vpop.f32.mrf.mxu3 }
 0x1d9   :  { %1859 = vst.msk [vmem:[%s3459_s3 + $0x138] sm:$0xff] %vm1819_vm2, %v1809_v53  ;;  %v1236_v58 = vadd.f32 %v3051_v36, %v1235_v56  ;;  %v1646_v59 = vadd.f32 %v3051_v36, %v1645_v57  ;;  %v892_v60 = vmax.f32 %v433_v54, %v843_v55 }
 0x1db   :  { %v1302_v61 = vmax.f32 %v1236_v58, 0.0  ;;  %v1712_v62 = vmax.f32 %v1646_v59, 0.0 }
 0x1dc   :  { %v369_v63 = vpop.f32.mrf.mxu0  ;;  %v779_v0 = vpop.f32.mrf.mxu1 }
 0x1dd   :  { %v1761_v1 = vmax.f32 %v1302_v61, %v1712_v62  ;;  %v370_v2 = vadd.f32 %v3051_v36, %v369_v63  ;;  %v780_v3 = vadd.f32 %v3051_v36, %v779_v0 }
 0x1df   :  { %v1810_v4 = vmax.f32 %v892_v60, %v1761_v1  ;;  %v434_v5 = vmax.f32 %v370_v2, 0.0  ;;  %v844_v6 = vmax.f32 %v780_v3, 0.0 }
 0x1e0   :  { %v1238_v7 = vpop.f32.mrf.mxu2  ;;  %v1648_v8 = vpop.f32.mrf.mxu3 }
 0x1e1   :  { %1860 = vst.msk [vmem:[%s3459_s3 + $0x140] sm:$0xff] %vm1819_vm2, %v1810_v4  ;;  %v1239_v9 = vadd.f32 %v3051_v36, %v1238_v7  ;;  %v1649_v11 = vadd.f32 %v3051_v36, %v1648_v8  ;;  %v893_v12 = vmax.f32 %v434_v5, %v844_v6 }
 0x1e3   :  { %v1303_v13 = vmax.f32 %v1239_v9, 0.0  ;;  %v1713_v14 = vmax.f32 %v1649_v11, 0.0 }
 0x1e4   :  { %v372_v15 = vpop.f32.mrf.mxu0  ;;  %v782_v16 = vpop.f32.mrf.mxu1 }
 0x1e5   :  { %v1762_v17 = vmax.f32 %v1303_v13, %v1713_v14  ;;  %v373_v18 = vadd.f32 %v3051_v36, %v372_v15  ;;  %v783_v19 = vadd.f32 %v3051_v36, %v782_v16 }
 0x1e7   :  { %v1811_v20 = vmax.f32 %v893_v12, %v1762_v17  ;;  %v435_v21 = vmax.f32 %v373_v18, 0.0  ;;  %v845_v22 = vmax.f32 %v783_v19, 0.0 }
 0x1e8   :  { %v1241_v23 = vpop.f32.mrf.mxu2  ;;  %v1651_v24 = vpop.f32.mrf.mxu3 }
 0x1e9   :  { %1861 = vst.msk [vmem:[%s3459_s3 + $0x148] sm:$0xff] %vm1819_vm2, %v1811_v20  ;;  %v1242_v25 = vadd.f32 %v3051_v36, %v1241_v23  ;;  %v1652_v26 = vadd.f32 %v3051_v36, %v1651_v24  ;;  %v894_v27 = vmax.f32 %v435_v21, %v845_v22 }
 0x1eb   :  { %v1304_v28 = vmax.f32 %v1242_v25, 0.0  ;;  %v1714_v29 = vmax.f32 %v1652_v26, 0.0 }
 0x1ec   :  { %v375_v30 = vpop.f32.mrf.mxu0  ;;  %v785_v31 = vpop.f32.mrf.mxu1 }
 0x1ed   :  { %v1763_v32 = vmax.f32 %v1304_v28, %v1714_v29  ;;  %v376_v33 = vadd.f32 %v3051_v36, %v375_v30  ;;  %v786_v34 = vadd.f32 %v3051_v36, %v785_v31 }
 0x1ef   :  { %v1812_v10 = vmax.f32 %v894_v27, %v1763_v32  ;;  %v436_v35 = vmax.f32 %v376_v33, 0.0  ;;  %v846_v37 = vmax.f32 %v786_v34, 0.0 }
 0x1f0   :  { %v1244_v38 = vpop.f32.mrf.mxu2  ;;  %v1654_v39 = vpop.f32.mrf.mxu3 }
 0x1f1   :  { %1862 = vst.msk [vmem:[%s3459_s3 + $0x150] sm:$0xff] %vm1819_vm2, %v1812_v10  ;;  %v1245_v40 = vadd.f32 %v3051_v36, %v1244_v38  ;;  %v1655_v41 = vadd.f32 %v3051_v36, %v1654_v39  ;;  %v895_v42 = vmax.f32 %v436_v35, %v846_v37  ;;  %v2222_v37 = vld [vmem:[%s3458_s2] ss:$0 sm:$0xff] }
 0x1f3   :  { %v1305_v43 = vmax.f32 %v1245_v40, 0.0  ;;  %v1715_v44 = vmax.f32 %v1655_v41, 0.0 }
 0x1f4   :  { %v378_v45 = vpop.f32.mrf.mxu0  ;;  %v788_v46 = vpop.f32.mrf.mxu1 }
 0x1f5   :  { %v1764_v47 = vmax.f32 %v1305_v43, %v1715_v44  ;;  %v379_v48 = vadd.f32 %v3051_v36, %v378_v45  ;;  %v789_v49 = vadd.f32 %v3051_v36, %v788_v46 }
 0x1f7   :  { %v1813_v50 = vmax.f32 %v895_v42, %v1764_v47  ;;  %v437_v51 = vmax.f32 %v379_v48, 0.0  ;;  %v847_v52 = vmax.f32 %v789_v49, 0.0 }
 0x1f8   :  { %v1247_v53 = vpop.f32.mrf.mxu2  ;;  %v1657_v54 = vpop.f32.mrf.mxu3 }
 0x1f9   :  { %1863 = vst.msk [vmem:[%s3459_s3 + $0x158] sm:$0xff] %vm1819_vm2, %v1813_v50  ;;  %v1248_v55 = vadd.f32 %v3051_v36, %v1247_v53  ;;  %v1658_v56 = vadd.f32 %v3051_v36, %v1657_v54  ;;  %v896_v57 = vmax.f32 %v437_v51, %v847_v52 }
 0x1fb   :  { %v1306_v58 = vmax.f32 %v1248_v55, 0.0  ;;  %v1716_v59 = vmax.f32 %v1658_v56, 0.0 }
 0x1fc   :  { %v381_v60 = vpop.f32.mrf.mxu0  ;;  %v791_v61 = vpop.f32.mrf.mxu1 }
 0x1fd   :  { %v1765_v62 = vmax.f32 %v1306_v58, %v1716_v59  ;;  %v382_v63 = vadd.f32 %v3051_v36, %v381_v60  ;;  %v792_v0 = vadd.f32 %v3051_v36, %v791_v61 }
 0x1ff   :  { %v1814_v1 = vmax.f32 %v896_v57, %v1765_v62  ;;  %v438_v2 = vmax.f32 %v382_v63, 0.0  ;;  %v848_v3 = vmax.f32 %v792_v0, 0.0 }
 0x200   :  { %v1250_v4 = vpop.f32.mrf.mxu2  ;;  %v1660_v5 = vpop.f32.mrf.mxu3 }
 0x201   :  { %1864 = vst.msk [vmem:[%s3459_s3 + $0x160] sm:$0xff] %vm1819_vm2, %v1814_v1  ;;  %v1251_v6 = vadd.f32 %v3051_v36, %v1250_v4  ;;  %v1661_v7 = vadd.f32 %v3051_v36, %v1660_v5  ;;  %v897_v8 = vmax.f32 %v438_v2, %v848_v3 }
 0x203   :  { %v1307_v9 = vmax.f32 %v1251_v6, 0.0  ;;  %v1717_v11 = vmax.f32 %v1661_v7, 0.0 }
 0x204   :  { %v384_v12 = vpop.f32.mrf.mxu0  ;;  %v794_v13 = vpop.f32.mrf.mxu1 }
 0x205   :  { %v1766_v14 = vmax.f32 %v1307_v9, %v1717_v11  ;;  %v385_v15 = vadd.f32 %v3051_v36, %v384_v12  ;;  %v795_v16 = vadd.f32 %v3051_v36, %v794_v13 }
 0x207   :  { %v1815_v17 = vmax.f32 %v897_v8, %v1766_v14  ;;  %v439_v18 = vmax.f32 %v385_v15, 0.0  ;;  %v849_v19 = vmax.f32 %v795_v16, 0.0 }
 0x208   :  { %v1253_v20 = vpop.f32.mrf.mxu2  ;;  %v1663_v21 = vpop.f32.mrf.mxu3 }
 0x209   :  { %1865 = vst.msk [vmem:[%s3459_s3 + $0x168] sm:$0xff] %vm1819_vm2, %v1815_v17  ;;  %v1254_v22 = vadd.f32 %v3051_v36, %v1253_v20  ;;  %v1664_v23 = vadd.f32 %v3051_v36, %v1663_v21  ;;  %v898_v24 = vmax.f32 %v439_v18, %v849_v19 }
 0x20b   :  { %v1308_v25 = vmax.f32 %v1254_v22, 0.0  ;;  %v1718_v26 = vmax.f32 %v1664_v23, 0.0 }
 0x20c   :  { %v387_v27 = vpop.f32.mrf.mxu0  ;;  %v797_v28 = vpop.f32.mrf.mxu1 }
 0x20d   :  { %v1767_v29 = vmax.f32 %v1308_v25, %v1718_v26  ;;  %v388_v30 = vadd.f32 %v3051_v36, %v387_v27  ;;  %v798_v31 = vadd.f32 %v3051_v36, %v797_v28 }
 0x20f   :  { %v1816_v32 = vmax.f32 %v898_v24, %v1767_v29  ;;  %v440_v33 = vmax.f32 %v388_v30, 0.0  ;;  %v850_v34 = vmax.f32 %v798_v31, 0.0 }
 0x210   :  { %v1256_v10 = vpop.f32.mrf.mxu2  ;;  %v1666_v35 = vpop.f32.mrf.mxu3 }
 0x211   :  { %1866 = vst.msk [vmem:[%s3459_s3 + $0x170] sm:$0xff] %vm1819_vm2, %v1816_v32  ;;  %v1257_v38 = vadd.f32 %v2222_v37, %v1256_v10  ;;  %v1667_v39 = vadd.f32 %v2222_v37, %v1666_v35  ;;  %v899_v40 = vmax.f32 %v440_v33, %v850_v34 }
 0x213   :  { %v1309_v41 = vmax.f32 %v1257_v38, 0.0  ;;  %v1719_v42 = vmax.f32 %v1667_v39, 0.0 }
 0x214   :  { %v390_v36 = vpop.f32.mrf.mxu0  ;;  %v800_v43 = vpop.f32.mrf.mxu1 }
 0x215   :  { %v1768_v44 = vmax.f32 %v1309_v41, %v1719_v42  ;;  %v391_v45 = vadd.f32 %v2222_v37, %v390_v36  ;;  %v801_v46 = vadd.f32 %v2222_v37, %v800_v43 }
 0x217   :  { %v1817_v47 = vmax.f32 %v899_v40, %v1768_v44  ;;  %v441_v48 = vmax.f32 %v391_v45, 0.0  ;;  %v851_v49 = vmax.f32 %v801_v46, 0.0 }
 0x218   :  { %v1259_v50 = vpop.f32.mrf.mxu2  ;;  %v1669_v51 = vpop.f32.mrf.mxu3 }
 0x219   :  { %1867 = vst.msk [vmem:[%s3459_s3 + $0x178] sm:$0xff] %vm1819_vm2, %v1817_v47  ;;  %v1260_v52 = vadd.f32 %v2222_v37, %v1259_v50  ;;  %v1670_v53 = vadd.f32 %v2222_v37, %v1669_v51  ;;  %v900_v54 = vmax.f32 %v441_v48, %v851_v49 }
 0x21b   :  { %v1310_v55 = vmax.f32 %v1260_v52, 0.0  ;;  %v1720_v56 = vmax.f32 %v1670_v53, 0.0 }
 0x21d   :  { %v1769_v57 = vmax.f32 %v1310_v55, %v1720_v56 }
 0x21f   :  { %v1818_v58 = vmax.f32 %v900_v54, %v1769_v57 }
 0x221   :  { %1868 = vst.msk [vmem:[%s3459_s3 + $0x180] sm:$0xff] %vm1819_vm2, %v1818_v58 }

// kernel: cnn_net_forward.4
= control target key start
LH: loop header
LB: loop body
LE: loop exit
PB: predicated region body
PF: predicated region fallthrough
CT: control target
= control target key end

     0   :  { %vm73_vm0 = vcmask 1045504   ;;  %vm51_vm1 = vcmask 179200   ;;  %vm538_vm2 = vcmask 130048   ;;  %vm545_vm3 = vcmask 123904   ;;  %s1137_s1 = inlined_call_operand.vmem [shape: f32[150,16], index: 1, kind: input, shape index: {}]   ;;  %s1138_s0 = inlined_call_operand.vmem [shape: f32[4,50,150], index: 0, kind: input, shape index: {}]   ;;  %s1139_s2 = inlined_call_operand.vmem [shape: f32[1,16], index: 2, kind: input, shape index: {}]   ;;  %s1140_s3 = inlined_call_operand.vmem [shape: f32[50,16], index: 3, kind: output, shape index: {}]  }
   0x1   :  { %v668_v0 = vld [vmem:[%s1137_s1 + $0x78] sm:$0xff]  ;;  %v673_v1 = vld [vmem:[%s1137_s1 + $0x90] sm:$0x3f]  ;;  %v685_v3 = vld [vmem:[%s1137_s1 + $0x88] sm:$0xff] }
   0x2   :  { %v678_v2 = vld [vmem:[%s1137_s1 + $0x70] sm:$0xff]  ;;  %77 = vmatpush.msra.mxu0 %v668_v0  ;;  %196 = vmatpush.msra.mxu2 %v668_v0  ;;  %v692_v4 = vld [vmem:[%s1137_s1 + $0x68] sm:$0xff]  ;;  %v701_v5 = vld [vmem:[%s1137_s1 + $0x80] sm:$0xff] }
   0x3   :  { %573 = vmatpush.msk.msra.mxu3 %vm73_vm0, %v673_v1  ;;  %551 = vmatpush.msk.msra.mxu1 %vm73_vm0, %v673_v1  ;;  %v560_v6 = vld [vmem:[%s1138_s0 + $0x78] sm:$0xff]  ;;  %v710_v7 = vld [vmem:[%s1137_s1 + $0x60] sm:$0xff]  ;;  %v35_v8 = vld [vmem:[%s1138_s0 + $0x8] sm:$0xff] }
   0x4   :  { %78 = vmatpush.msra.mxu0 %v678_v2  ;;  %197 = vmatpush.msra.mxu2 %v678_v2  ;;  %v722_v9 = vld [vmem:[%s1137_s1 + $0x58] sm:$0xff]  ;;  %v732_v10 = vld [vmem:[%s1137_s1 + $0x50] sm:$0xff]  ;;  %v741_v11 = vld [vmem:[%s1137_s1 + $0x48] sm:$0xff] }
   0x5   :  { %248 = vmatpush.msra.mxu3 %v685_v3  ;;  %129 = vmatpush.msra.mxu1 %v685_v3  ;;  %v562_v12 = vld [vmem:[%s1138_s0 + $0x88] sm:$0xff]  ;;  %v753_v13 = vld [vmem:[%s1137_s1 + $0x40] sm:$0xff]  ;;  %v37_v14 = vld [vmem:[%s1138_s0 + $0x18] sm:$0xff] }
   0x6   :  { %79 = vmatpush.msra.mxu0 %v692_v4  ;;  %198 = vmatpush.msra.mxu2 %v692_v4  ;;  %v765_v15 = vld [vmem:[%s1137_s1 + $0x38] sm:$0xff]  ;;  %v775_v16 = vld [vmem:[%s1137_s1 + $0x30] sm:$0xff]  ;;  %v783_v17 = vld [vmem:[%s1137_s1 + $0x28] sm:$0xff] }
   0x7   :  { %249 = vmatpush.msra.mxu3 %v701_v5  ;;  %130 = vmatpush.msra.mxu1 %v701_v5  ;;  %v564_v18 = vld [vmem:[%s1138_s0 + $0x98] sm:$0xff]  ;;  %v796_v19 = vld [vmem:[%s1137_s1 + $0x20] sm:$0xff]  ;;  %v39_v20 = vld [vmem:[%s1138_s0 + $0x28] sm:$0xff] }
   0x8   :  { %574 = vmatmul.msk.f32.vlgmr.msra.gmra.mxu3 %vm51_vm1, %v560_v6  ;;  %80 = vmatpush.msra.mxu0 %v710_v7  ;;  %v808_v21 = vld [vmem:[%s1137_s1 + $0x18] sm:$0xff]  ;;  %v818_v22 = vld [vmem:[%s1137_s1 + $0x10] sm:$0xff]  ;;  %v826_v23 = vld [vmem:[%s1137_s1 + $0x8] sm:$0xff] }
   0x9   :  { %199 = vmatpush.msra.mxu2 %v710_v7  ;;  %552 = vmatmul.msk.f32.vlgmr.msra.gmra.mxu1 %vm51_vm1, %v35_v8  ;;  %v566_v24 = vld [vmem:[%s1138_s0 + $0xa8] sm:$0xff]  ;;  %v837_v25 = vld [vmem:[%s1137_s1] sm:$0xff]  ;;  %v559_v27 = vld [vmem:[%s1138_s0 + $0x70] sm:$0xff] }
   0xa   :  { %81 = vmatpush.msra.mxu0 %v722_v9  ;;  %595 = vmatpush.msk.msrb.mxu3 %vm73_vm0, %v673_v1  ;;  %v34_v26 = vld [vmem:[%s1138_s0] sm:$0xff]  ;;  %v41_v28 = vld [vmem:[%s1138_s0 + $0x38] sm:$0xff]  ;;  %v36_v30 = vld [vmem:[%s1138_s0 + $0x10] sm:$0xff] }
   0xb   :  { %200 = vmatpush.msra.mxu2 %v722_v9  ;;  %322 = vmatpush.msrb.mxu1 %v668_v0  ;;  %v568_v29 = vld [vmem:[%s1138_s0 + $0xb8] sm:$0xff]  ;;  %v561_v31 = vld [vmem:[%s1138_s0 + $0x80] sm:$0xff]  ;;  %v43_v32 = vld [vmem:[%s1138_s0 + $0x48] sm:$0xff] }
   0xc   :  { %82 = vmatpush.msra.mxu0 %v732_v10  ;;  %374 = vmatpush.msrb.mxu3 %v685_v3  ;;  %v570_v33 = vld [vmem:[%s1138_s0 + $0xc8] sm:$0xff]  ;;  %v38_v34 = vld [vmem:[%s1138_s0 + $0x20] sm:$0xff]  ;;  %v563_v35 = vld [vmem:[%s1138_s0 + $0x90] sm:$0xff] }
   0xd   :  { %201 = vmatpush.msra.mxu2 %v732_v10  ;;  %323 = vmatpush.msrb.mxu1 %v678_v2  ;;  %v45_v36 = vld [vmem:[%s1138_s0 + $0x58] sm:$0xff]  ;;  %v40_v38 = vld [vmem:[%s1138_s0 + $0x30] sm:$0xff]  ;;  %v565_v39 = vld [vmem:[%s1138_s0 + $0xa0] sm:$0xff] }
   0xe   :  { %83 = vmatpush.msra.mxu0 %v741_v11  ;;  %375 = vmatpush.msrb.mxu3 %v701_v5  ;;  %v572_v37 = vld [vmem:[%s1138_s0 + $0xd8] sm:$0x3]  ;;  %v47_v40 = vld [vmem:[%s1138_s0 + $0x68] sm:$0x3]  ;;  %v42_v42 = vld [vmem:[%s1138_s0 + $0x40] sm:$0xff] }
   0xf   :  { %202 = vmatpush.msra.mxu2 %v741_v11  ;;  %324 = vmatpush.msrb.mxu1 %v692_v4  ;;  %v582_v41 = vld [vmem:[%s1138_s0 + $0xe8] sm:$0xff]  ;;  %v567_v43 = vld [vmem:[%s1138_s0 + $0xb0] sm:$0xff]  ;;  %v581_v44 = vld [vmem:[%s1138_s0 + $0xe0] sm:$0xff] }
  0x10   :  { %575 = vmatmul.msk.f32.gmra.mxu3 %vm51_vm1, %v562_v12  ;;  %84 = vmatpush.msra.mxu0 %v753_v13  ;;  %v584_v45 = vld [vmem:[%s1138_s0 + $0xf8] sm:$0xff]  ;;  %v44_v46 = vld [vmem:[%s1138_s0 + $0x50] sm:$0xff]  ;;  %v569_v47 = vld [vmem:[%s1138_s0 + $0xc0] sm:$0xff] }
  0x11   :  { %203 = vmatpush.msra.mxu2 %v753_v13  ;;  %553 = vmatmul.msk.f32.gmra.mxu1 %vm51_vm1, %v37_v14  ;;  %v583_v48 = vld [vmem:[%s1138_s0 + $0xf0] sm:$0xff]  ;;  %v586_v49 = vld [vmem:[%s1138_s0 + $0x108] sm:$0xff]  ;;  %v46_v50 = vld [vmem:[%s1138_s0 + $0x60] sm:$0x3] }
  0x12   :  { %85 = vmatpush.msra.mxu0 %v765_v15  ;;  %325 = vmatpush.msrb.mxu1 %v710_v7  ;;  %v571_v51 = vld [vmem:[%s1138_s0 + $0xd0] sm:$0x3]  ;;  %v585_v52 = vld [vmem:[%s1138_s0 + $0x100] sm:$0xff]  ;;  %v588_v53 = vld [vmem:[%s1138_s0 + $0x118] sm:$0xff] }
  0x13   :  { %204 = vmatpush.msra.mxu2 %v765_v15  ;;  %641 = vmatpush.msk.msra.mxu3 %vm73_vm0, %v673_v1  ;;  %v603_v54 = vld [vmem:[%s1138_s0 + $0x150] sm:$0xff]  ;;  %v604_v55 = vld [vmem:[%s1138_s0 + $0x158] sm:$0xff]  ;;  %v590_v57 = vld [vmem:[%s1138_s0 + $0x128] sm:$0xff] }
  0x14   :  { %86 = vmatpush.msra.mxu0 %v775_v16  ;;  %326 = vmatpush.msrb.mxu1 %v722_v9  ;;  %v587_v56 = vld [vmem:[%s1138_s0 + $0x110] sm:$0xff]  ;;  %v605_v58 = vld [vmem:[%s1138_s0 + $0x160] sm:$0xff]  ;;  %v606_v59 = vld [vmem:[%s1138_s0 + $0x168] sm:$0xff] }
  0x15   :  { %205 = vmatpush.msra.mxu2 %v775_v16  ;;  %642 = vmatpush.msra.mxu3 %v685_v3  ;;  %v589_v60 = vld [vmem:[%s1138_s0 + $0x120] sm:$0xff]  ;;  %v592_v61 = vld [vmem:[%s1138_s0 + $0x138] sm:$0xff]  ;;  %v607_v62 = vld [vmem:[%s1138_s0 + $0x170] sm:$0xff] }
  0x16   :  { %87 = vmatpush.msra.mxu0 %v783_v17  ;;  %327 = vmatpush.msrb.mxu1 %v732_v10  ;;  %v608_v63 = vld [vmem:[%s1138_s0 + $0x178] sm:$0xff]  ;;  %v611_v6 = vld [vmem:[%s1138_s0 + $0x190] sm:$0xff] }
  0x17   :  { %206 = vmatpush.msra.mxu2 %v783_v17  ;;  %643 = vmatpush.msra.mxu3 %v701_v5  ;;  %v615_v8 = vld [vmem:[%s1138_s0 + $0x1b0] sm:$0x3] }
  0x18   :  { %576 = vmatmul.msk.f32.gmra.mxu3 %vm51_vm1, %v564_v18  ;;  %88 = vmatpush.msra.mxu0 %v796_v19 }
  0x19   :  { %207 = vmatpush.msra.mxu2 %v796_v19  ;;  %554 = vmatmul.msk.f32.gmra.mxu1 %vm51_vm1, %v39_v20 }
  0x1a   :  { %89 = vmatpush.msra.mxu0 %v808_v21  ;;  %328 = vmatpush.msrb.mxu1 %v741_v11 }
  0x1b   :  { %208 = vmatpush.msra.mxu2 %v808_v21 }
  0x1c   :  { %90 = vmatpush.msra.mxu0 %v818_v22  ;;  %329 = vmatpush.msrb.mxu1 %v753_v13 }
  0x1d   :  { %209 = vmatpush.msra.mxu2 %v818_v22 }
  0x1e   :  { %91 = vmatpush.msra.mxu0 %v826_v23  ;;  %330 = vmatpush.msrb.mxu1 %v765_v15 }
  0x1f   :  { %210 = vmatpush.msra.mxu2 %v826_v23 }
  0x20   :  { %577 = vmatmul.msk.f32.gmra.mxu3 %vm51_vm1, %v566_v24  ;;  %92 = vmatpush.msra.mxu0 %v837_v25 }
  0x21   :  { %211 = vmatpush.msra.mxu2 %v837_v25  ;;  %93 = vmatmul.f32.vlgmr.msra.gmra.mxu0 %v34_v26 }
  0x22   :  { %212 = vmatmul.f32.vlgmr.msra.gmra.mxu2 %v559_v27  ;;  %555 = vmatmul.msk.f32.gmra.mxu1 %vm51_vm1, %v41_v28 }
  0x23   :  { %617 = vmatpush.msk.msrb.mxu2 %vm73_vm0, %v673_v1  ;;  %441 = vmatpush.msrb.mxu0 %v668_v0  ;;  %v594_v1 = vld [vmem:[%s1138_s0 + $0x148] sm:$0x3] }
  0x24   :  { %331 = vmatpush.msrb.mxu1 %v775_v16 }
  0x25   :  { %442 = vmatpush.msrb.mxu0 %v678_v2  ;;  %493 = vmatpush.msrb.mxu2 %v685_v3  ;;  %v610_v3 = vld [vmem:[%s1138_s0 + $0x188] sm:$0xff] }
  0x26   :  { %332 = vmatpush.msrb.mxu1 %v783_v17 }
  0x27   :  { %443 = vmatpush.msrb.mxu0 %v692_v4  ;;  %494 = vmatpush.msrb.mxu2 %v701_v5  ;;  %v616_v5 = vld [vmem:[%s1138_s0 + $0x1b8] sm:$0x3] }
  0x28   :  { %578 = vmatmul.msk.f32.gmra.mxu3 %vm51_vm1, %v568_v29  ;;  %333 = vmatpush.msrb.mxu1 %v796_v19 }
  0x29   :  { %96 = vmatmul.f32.gmra.mxu0 %v36_v30 }
  0x2a   :  { %215 = vmatmul.f32.gmra.mxu2 %v561_v31  ;;  %556 = vmatmul.msk.f32.gmra.mxu1 %vm51_vm1, %v43_v32 }
  0x2b   :  { %444 = vmatpush.msrb.mxu0 %v710_v7  ;;  %334 = vmatpush.msrb.mxu1 %v808_v21 }
  0x2d   :  { %445 = vmatpush.msrb.mxu0 %v722_v9  ;;  %335 = vmatpush.msrb.mxu1 %v818_v22 }
  0x2f   :  { %446 = vmatpush.msrb.mxu0 %v732_v10  ;;  %336 = vmatpush.msrb.mxu1 %v826_v23 }
  0x30   :  { %579 = vmatmul.msk.f32.gmra.mxu3 %vm51_vm1, %v570_v33 }
  0x31   :  { %99 = vmatmul.f32.gmra.mxu0 %v38_v34  ;;  %337 = vmatpush.msrb.mxu1 %v837_v25 }
  0x32   :  { %218 = vmatmul.f32.gmra.mxu2 %v563_v35  ;;  %557 = vmatmul.msk.f32.gmra.mxu1 %vm51_vm1, %v45_v36 }
  0x33   :  { %447 = vmatpush.msrb.mxu0 %v741_v11  ;;  %625 = vmatpush.msra.mxu1 %v668_v0  ;;  %v591_v0 = vld [vmem:[%s1138_s0 + $0x130] sm:$0xff] }
  0x35   :  { %448 = vmatpush.msrb.mxu0 %v753_v13  ;;  %626 = vmatpush.msra.mxu1 %v678_v2  ;;  %v609_v2 = vld [vmem:[%s1138_s0 + $0x180] sm:$0xff] }
  0x37   :  { %449 = vmatpush.msrb.mxu0 %v765_v15  ;;  %627 = vmatpush.msra.mxu1 %v692_v4  ;;  %v593_v4 = vld [vmem:[%s1138_s0 + $0x140] sm:$0x3] }
  0x38   :  { %580 = vmatmul.msk.f32.gmra.mxu3 %vm51_vm1, %v572_v37 }
  0x39   :  { %102 = vmatmul.f32.gmra.mxu0 %v40_v38  ;;  %628 = vmatpush.msra.mxu1 %v710_v7  ;;  %v612_v7 = vld [vmem:[%s1138_s0 + $0x198] sm:$0xff] }
  0x3a   :  { %221 = vmatmul.f32.gmra.mxu2 %v565_v39  ;;  %558 = vmatmul.msk.f32.gmra.mxu1 %vm51_vm1, %v47_v40 }
  0x3b   :  { %450 = vmatpush.msrb.mxu0 %v775_v16  ;;  %629 = vmatpush.msra.mxu1 %v722_v9  ;;  %v613_v9 = vld [vmem:[%s1138_s0 + $0x1a0] sm:$0xff] }
  0x3d   :  { %451 = vmatpush.msrb.mxu0 %v783_v17  ;;  %630 = vmatpush.msra.mxu1 %v732_v10  ;;  %v614_v10 = vld [vmem:[%s1138_s0 + $0x1a8] sm:$0xff] }
  0x3f   :  { %452 = vmatpush.msrb.mxu0 %v796_v19  ;;  %631 = vmatpush.msra.mxu1 %v741_v11 }
  0x40   :  { %596 = vmatmul.msk.f32.vlgmr.msrb.gmra.mxu3 %vm51_vm1, %v582_v41 }
  0x41   :  { %105 = vmatmul.f32.gmra.mxu0 %v42_v42  ;;  %632 = vmatpush.msra.mxu1 %v753_v13 }
  0x42   :  { %224 = vmatmul.f32.gmra.mxu2 %v567_v43  ;;  %338 = vmatmul.f32.vlgmr.msrb.gmra.mxu1 %v581_v44 }
  0x43   :  { %453 = vmatpush.msrb.mxu0 %v808_v21  ;;  %633 = vmatpush.msra.mxu1 %v765_v15 }
  0x45   :  { %454 = vmatpush.msrb.mxu0 %v818_v22  ;;  %634 = vmatpush.msra.mxu1 %v775_v16 }
  0x47   :  { %455 = vmatpush.msrb.mxu0 %v826_v23  ;;  %635 = vmatpush.msra.mxu1 %v783_v17  ;;  %v1059_v17 = vld [vmem:[%s1139_s2] ss:$0 sm:$0xff] }
  0x48   :  { %597 = vmatmul.msk.f32.gmra.mxu3 %vm51_vm1, %v584_v45 }
  0x49   :  { %108 = vmatmul.f32.gmra.mxu0 %v44_v46  ;;  %636 = vmatpush.msra.mxu1 %v796_v19 }
  0x4a   :  { %227 = vmatmul.f32.gmra.mxu2 %v569_v47  ;;  %341 = vmatmul.f32.gmra.mxu1 %v583_v48 }
  0x4b   :  { %456 = vmatpush.msrb.mxu0 %v837_v25  ;;  %637 = vmatpush.msra.mxu1 %v808_v21 }
  0x4d   :  { %638 = vmatpush.msra.mxu1 %v818_v22 }
  0x4f   :  { %639 = vmatpush.msra.mxu1 %v826_v23 }
  0x50   :  { %598 = vmatmul.msk.f32.gmra.mxu3 %vm51_vm1, %v586_v49 }
  0x51   :  { %111 = vmatmul.f32.gmra.mxu0 %v46_v50  ;;  %640 = vmatpush.msra.mxu1 %v837_v25 }
  0x52   :  { %230 = vmatmul.f32.gmra.mxu2 %v571_v51  ;;  %344 = vmatmul.f32.gmra.mxu1 %v585_v52 }
  0x58   :  { %599 = vmatmul.msk.f32.gmra.mxu3 %vm51_vm1, %v588_v53 }
  0x59   :  { %457 = vmatmul.f32.vlgmr.msrb.gmra.mxu0 %v603_v54 }
  0x5a   :  { %618 = vmatmul.msk.f32.vlgmr.msrb.gmra.mxu2 %vm51_vm1, %v604_v55  ;;  %347 = vmatmul.f32.gmra.mxu1 %v587_v56 }
  0x60   :  { %600 = vmatmul.msk.f32.gmra.mxu3 %vm51_vm1, %v590_v57 }
  0x61   :  { %460 = vmatmul.f32.gmra.mxu0 %v605_v58 }
  0x62   :  { %619 = vmatmul.msk.f32.gmra.mxu2 %vm51_vm1, %v606_v59  ;;  %350 = vmatmul.f32.gmra.mxu1 %v589_v60 }
  0x68   :  { %601 = vmatmul.msk.f32.gmra.mxu3 %vm51_vm1, %v592_v61 }
  0x69   :  { %463 = vmatmul.f32.gmra.mxu0 %v607_v62 }
  0x6a   :  { %620 = vmatmul.msk.f32.gmra.mxu2 %vm51_vm1, %v608_v63  ;;  %353 = vmatmul.f32.gmra.mxu1 %v591_v0 }
  0x70   :  { %602 = vmatmul.msk.f32.gmra.mxu3 %vm51_vm1, %v594_v1 }
  0x71   :  { %466 = vmatmul.f32.gmra.mxu0 %v609_v2 }
  0x72   :  { %621 = vmatmul.msk.f32.gmra.mxu2 %vm51_vm1, %v610_v3  ;;  %356 = vmatmul.f32.gmra.mxu1 %v593_v4 }
  0x78   :  { %624 = vmatmul.msk.f32.vlgmr.msra.gmra.mxu3 %vm51_vm1, %v616_v5 }
  0x79   :  { %469 = vmatmul.f32.gmra.mxu0 %v611_v6 }
  0x7a   :  { %622 = vmatmul.msk.f32.gmra.mxu2 %vm51_vm1, %v612_v7  ;;  %475 = vmatmul.f32.vlgmr.msra.gmra.mxu1 %v615_v8 }
  0x81   :  { %472 = vmatmul.f32.gmra.mxu0 %v613_v9 }
  0x82   :  { %623 = vmatmul.msk.f32.gmra.mxu2 %vm51_vm1, %v614_v10 }
  0x86   :  { %v132_v11 = vpop.f32.mrf.mxu1 }
  0x8b   :  { %v251_v12 = vpop.f32.mrf.mxu3 }
  0x8e   :  { %v135_v13 = vpop.f32.mrf.mxu1 }
  0x93   :  { %v254_v14 = vpop.f32.mrf.mxu3 }
  0x96   :  { %v138_v15 = vpop.f32.mrf.mxu1 }
  0x9b   :  { %v257_v16 = vpop.f32.mrf.mxu3 }
  0x9e   :  { %v94_v18 = vpop.f32.mrf.mxu0 }
  0x9f   :  { %v141_v19 = vpop.f32.mrf.mxu1  ;;  %v95_v20 = vadd.f32 %v1059_v17, %v94_v18 }
  0xa1   :  { %v133_v23 = vadd.f32 %v132_v11, %v95_v20 }
  0xa3   :  { %v260_v21 = vpop.f32.mrf.mxu3  ;;  %v153_v28 = vmax.f32 %v133_v23, 0.0 }
  0xa5   :  { %v213_v22 = vpop.f32.mrf.mxu2 }
  0xa6   :  { %v214_v24 = vadd.f32 %v1059_v17, %v213_v22  ;;  %v97_v25 = vpop.f32.mrf.mxu0 }
  0xa7   :  { %v144_v26 = vpop.f32.mrf.mxu1  ;;  %v98_v30 = vadd.f32 %v1059_v17, %v97_v25 }
  0xa8   :  { %v252_v27 = vadd.f32 %v251_v12, %v214_v24 }
  0xa9   :  { %v136_v34 = vadd.f32 %v135_v13, %v98_v30 }
  0xaa   :  { %v272_v29 = vmax.f32 %v252_v27, 0.0 }
  0xab   :  { %v263_v31 = vpop.f32.mrf.mxu3  ;;  %v154_v39 = vmax.f32 %v136_v34, 0.0 }
  0xac   :  { %v1064_v32 = vmax.f32 %v153_v28, %v272_v29 }
  0xad   :  { %v216_v33 = vpop.f32.mrf.mxu2 }
  0xae   :  { %v217_v35 = vadd.f32 %v1059_v17, %v216_v33  ;;  %v100_v36 = vpop.f32.mrf.mxu0 }
  0xaf   :  { %v147_v37 = vpop.f32.mrf.mxu1  ;;  %v101_v41 = vadd.f32 %v1059_v17, %v100_v36 }
  0xb0   :  { %v255_v38 = vadd.f32 %v254_v14, %v217_v35 }
  0xb1   :  { %v139_v45 = vadd.f32 %v138_v15, %v101_v41 }
  0xb2   :  { %v273_v40 = vmax.f32 %v255_v38, 0.0 }
  0xb3   :  { %v266_v42 = vpop.f32.mrf.mxu3  ;;  %v155_v50 = vmax.f32 %v139_v45, 0.0 }
  0xb4   :  { %v1068_v43 = vmax.f32 %v154_v39, %v273_v40 }
  0xb5   :  { %v219_v44 = vpop.f32.mrf.mxu2 }
  0xb6   :  { %v220_v46 = vadd.f32 %v1059_v17, %v219_v44  ;;  %v103_v47 = vpop.f32.mrf.mxu0 }
  0xb7   :  { %v150_v48 = vpop.f32.mrf.mxu1  ;;  %v104_v52 = vadd.f32 %v1059_v17, %v103_v47 }
  0xb8   :  { %v258_v49 = vadd.f32 %v257_v16, %v220_v46 }
  0xb9   :  { %v142_v56 = vadd.f32 %v141_v19, %v104_v52 }
  0xba   :  { %v274_v51 = vmax.f32 %v258_v49, 0.0 }
  0xbb   :  { %v269_v53 = vpop.f32.mrf.mxu3  ;;  %v156_v61 = vmax.f32 %v142_v56, 0.0 }
  0xbc   :  { %v1072_v54 = vmax.f32 %v155_v50, %v274_v51 }
  0xbd   :  { %v222_v55 = vpop.f32.mrf.mxu2 }
  0xbe   :  { %v223_v57 = vadd.f32 %v1059_v17, %v222_v55  ;;  %v106_v58 = vpop.f32.mrf.mxu0 }
  0xbf   :  { %v339_v59 = vpop.f32.mrf.mxu1  ;;  %v107_v63 = vadd.f32 %v1059_v17, %v106_v58 }
  0xc0   :  { %v261_v60 = vadd.f32 %v260_v21, %v223_v57  ;;  %v340_v30 = vadd.f32 %v1059_v17, %v339_v59 }
  0xc1   :  { %v145_v3 = vadd.f32 %v144_v26, %v107_v63 }
  0xc2   :  { %v275_v62 = vmax.f32 %v261_v60, 0.0 }
  0xc3   :  { %v377_v0 = vpop.f32.mrf.mxu3  ;;  %v157_v8 = vmax.f32 %v145_v3, 0.0 }
  0xc4   :  { %v1076_v1 = vmax.f32 %v156_v61, %v275_v62 }
  0xc5   :  { %v225_v2 = vpop.f32.mrf.mxu2 }
  0xc6   :  { %v226_v4 = vadd.f32 %v1059_v17, %v225_v2  ;;  %v109_v5 = vpop.f32.mrf.mxu0 }
  0xc7   :  { %v342_v6 = vpop.f32.mrf.mxu1  ;;  %v110_v10 = vadd.f32 %v1059_v17, %v109_v5 }
  0xc8   :  { %v264_v7 = vadd.f32 %v263_v31, %v226_v4  ;;  %v343_v45 = vadd.f32 %v1059_v17, %v342_v6 }
  0xc9   :  { %v148_v14 = vadd.f32 %v147_v37, %v110_v10  ;;  %v378_v37 = vadd.f32 %v377_v0, %v340_v30 }
  0xca   :  { %v276_v9 = vmax.f32 %v264_v7, 0.0 }
  0xcb   :  { %v380_v11 = vpop.f32.mrf.mxu3  ;;  %v158_v20 = vmax.f32 %v148_v14, 0.0  ;;  %v398_v44 = vmax.f32 %v378_v37, 0.0 }
  0xcc   :  { %v1080_v12 = vmax.f32 %v157_v8, %v276_v9  ;;  %v381_v50 = vadd.f32 %v380_v11, %v343_v45 }
  0xcd   :  { %v228_v13 = vpop.f32.mrf.mxu2 }
  0xce   :  { %v229_v15 = vadd.f32 %v1059_v17, %v228_v13  ;;  %v112_v16 = vpop.f32.mrf.mxu0  ;;  %v399_v57 = vmax.f32 %v381_v50, 0.0 }
  0xcf   :  { %v345_v18 = vpop.f32.mrf.mxu1  ;;  %v113_v22 = vadd.f32 %v1059_v17, %v112_v16 }
  0xd0   :  { %v267_v19 = vadd.f32 %v266_v42, %v229_v15  ;;  %v346_v58 = vadd.f32 %v1059_v17, %v345_v18 }
  0xd1   :  { %v151_v26 = vadd.f32 %v150_v48, %v113_v22 }
  0xd2   :  { %v277_v21 = vmax.f32 %v267_v19, 0.0 }
  0xd3   :  { %v383_v23 = vpop.f32.mrf.mxu3  ;;  %v159_v33 = vmax.f32 %v151_v26, 0.0 }
  0xd4   :  { %v1084_v24 = vmax.f32 %v158_v20, %v277_v21  ;;  %v384_v63 = vadd.f32 %v383_v23, %v346_v58 }
  0xd5   :  { %v231_v25 = vpop.f32.mrf.mxu2 }
  0xd6   :  { %v232_v27 = vadd.f32 %v1059_v17, %v231_v25  ;;  %v458_v28 = vpop.f32.mrf.mxu0  ;;  %v400_v6 = vmax.f32 %v384_v63, 0.0 }
  0xd7   :  { %v348_v29 = vpop.f32.mrf.mxu1  ;;  %v459_v35 = vadd.f32 %v1059_v17, %v458_v28 }
  0xd8   :  { %v270_v31 = vadd.f32 %v269_v53, %v232_v27  ;;  %v349_v4 = vadd.f32 %v1059_v17, %v348_v29 }
  0xda   :  { %v278_v34 = vmax.f32 %v270_v31, 0.0 }
  0xdb   :  { %v386_v36 = vpop.f32.mrf.mxu3 }
  0xdc   :  { %v1089_v38 = vmax.f32 %v159_v33, %v278_v34  ;;  %v387_v10 = vadd.f32 %v386_v36, %v349_v4 }
  0xdd   :  { %v496_v39 = vpop.f32.mrf.mxu2 }
  0xde   :  { %v497_v40 = vadd.f32 %v496_v39, %v459_v35  ;;  %v461_v41 = vpop.f32.mrf.mxu0  ;;  %v401_v18 = vmax.f32 %v387_v10, 0.0 }
  0xdf   :  { %v351_v42 = vpop.f32.mrf.mxu1  ;;  %v462_v48 = vadd.f32 %v1059_v17, %v461_v41 }
  0xe0   :  { %v517_v46 = vmax.f32 %v497_v40, 0.0  ;;  %v352_v20 = vadd.f32 %v1059_v17, %v351_v42 }
  0xe2   :  { %v524_v47 = vmax.f32 %v398_v44, %v517_v46 }
  0xe3   :  { %v389_v49 = vpop.f32.mrf.mxu3 }
  0xe4   :  { %v531_v51 = vmax.f32 %v1064_v32, %v524_v47  ;;  %v390_v27 = vadd.f32 %v389_v49, %v352_v20 }
  0xe5   :  { %v499_v52 = vpop.f32.mrf.mxu2 }
  0xe6   :  { %539 = vst.msk [vmem:[%s1140_s3] sm:$0xff] %vm538_vm2, %v531_v51  ;;  %v500_v53 = vadd.f32 %v499_v52, %v462_v48  ;;  %v464_v55 = vpop.f32.mrf.mxu0  ;;  %v402_v36 = vmax.f32 %v390_v27, 0.0 }
  0xe7   :  { %v354_v56 = vpop.f32.mrf.mxu1  ;;  %v465_v61 = vadd.f32 %v1059_v17, %v464_v55 }
  0xe8   :  { %v518_v59 = vmax.f32 %v500_v53, 0.0  ;;  %v355_v37 = vadd.f32 %v1059_v17, %v354_v56 }
  0xea   :  { %v525_v60 = vmax.f32 %v399_v57, %v518_v59 }
  0xeb   :  { %v392_v62 = vpop.f32.mrf.mxu3 }
  0xec   :  { %v532_v32 = vmax.f32 %v1068_v43, %v525_v60  ;;  %v393_v44 = vadd.f32 %v392_v62, %v355_v37 }
  0xed   :  { %v502_v0 = vpop.f32.mrf.mxu2 }
  0xee   :  { %540 = vst.msk [vmem:[%s1140_s3 + $0x8] sm:$0xff] %vm538_vm2, %v532_v32  ;;  %v503_v2 = vadd.f32 %v502_v0, %v465_v61  ;;  %v467_v3 = vpop.f32.mrf.mxu0  ;;  %v403_v48 = vmax.f32 %v393_v44, 0.0 }
  0xef   :  { %v357_v5 = vpop.f32.mrf.mxu1  ;;  %v468_v9 = vadd.f32 %v1059_v17, %v467_v3 }
  0xf0   :  { %v519_v7 = vmax.f32 %v503_v2, 0.0  ;;  %v358_v13 = vadd.f32 %v1059_v17, %v357_v5 }
  0xf2   :  { %v526_v8 = vmax.f32 %v400_v6, %v519_v7 }
  0xf3   :  { %v395_v11 = vpop.f32.mrf.mxu3 }
  0xf4   :  { %v533_v43 = vmax.f32 %v1072_v54, %v526_v8  ;;  %v396_v21 = vadd.f32 %v395_v11, %v358_v13 }
  0xf5   :  { %v505_v14 = vpop.f32.mrf.mxu2 }
  0xf6   :  { %541 = vst.msk [vmem:[%s1140_s3 + $0x10] sm:$0xff] %vm538_vm2, %v533_v43  ;;  %v506_v15 = vadd.f32 %v505_v14, %v468_v9  ;;  %v470_v16 = vpop.f32.mrf.mxu0  ;;  %v404_v28 = vmax.f32 %v396_v21, 0.0 }
  0xf7   :  { %v476_v19 = vpop.f32.mrf.mxu1  ;;  %v471_v54 = vadd.f32 %v1059_v17, %v470_v16 }
  0xf8   :  { %v520_v22 = vmax.f32 %v506_v15, 0.0  ;;  %v477_v23 = vadd.f32 %v1059_v17, %v476_v19 }
  0xfa   :  { %v527_v25 = vmax.f32 %v401_v18, %v520_v22 }
  0xfb   :  { %v514_v26 = vpop.f32.mrf.mxu3 }
  0xfc   :  { %v534_v29 = vmax.f32 %v1076_v1, %v527_v25  ;;  %v515_v30 = vadd.f32 %v514_v26, %v477_v23 }
  0xfd   :  { %v508_v31 = vpop.f32.mrf.mxu2 }
  0xfe   :  { %542 = vst.msk [vmem:[%s1140_s3 + $0x18] sm:$0xff] %vm538_vm2, %v534_v29  ;;  %v523_v33 = vmax.f32 %v515_v30, 0.0  ;;  %v509_v34 = vadd.f32 %v508_v31, %v471_v54  ;;  %v473_v35 = vpop.f32.mrf.mxu0 }
  0xff   :  { %v474_v1 = vadd.f32 %v1059_v17, %v473_v35 }
 0x100   :  { %v530_v39 = vmax.f32 %v404_v28, %v523_v33  ;;  %v521_v40 = vmax.f32 %v509_v34, 0.0 }
 0x102   :  { %v537_v41 = vmax.f32 %v1089_v38, %v530_v39  ;;  %v528_v42 = vmax.f32 %v402_v36, %v521_v40 }
 0x104   :  { %546 = vst.msk [vmem:[%s1140_s3 + $0x30] sm:$0x3] %vm545_vm3, %v537_v41  ;;  %v535_v45 = vmax.f32 %v1080_v12, %v528_v42 }
 0x105   :  { %v511_v46 = vpop.f32.mrf.mxu2 }
 0x106   :  { %543 = vst.msk [vmem:[%s1140_s3 + $0x20] sm:$0xff] %vm538_vm2, %v535_v45  ;;  %v512_v47 = vadd.f32 %v511_v46, %v474_v1 }
 0x108   :  { %v522_v49 = vmax.f32 %v512_v47, 0.0 }
 0x10a   :  { %v529_v38 = vmax.f32 %v403_v48, %v522_v49 }
 0x10c   :  { %v536_v50 = vmax.f32 %v1084_v24, %v529_v38 }
 0x10e   :  { %544 = vst.msk [vmem:[%s1140_s3 + $0x28] sm:$0xff] %vm538_vm2, %v536_v50 }

// kernel: cnn_net_forward.5
= control target key start
LH: loop header
LB: loop body
LE: loop exit
PB: predicated region body
PF: predicated region fallthrough
CT: control target
= control target key end

     0   :  { %s598_s0 = inlined_call_operand.vmem [shape: f32[2,400], index: 0, kind: input, shape index: {}]   ;;  %s599_s1 = inlined_call_operand.vmem [shape: f32[400,120], index: 1, kind: input, shape index: {}]   ;;  %s600_s2 = inlined_call_operand.vmem [shape: f32[1,120], index: 2, kind: input, shape index: {}]   ;;  %s601_s3 = inlined_call_operand.vmem [shape: f32[120,84], index: 3, kind: input, shape index: {}]   ;;  %s602_s4 = inlined_call_operand.vmem [shape: f32[1,84], index: 4, kind: input, shape index: {}]   ;;  %s603_s5 = inlined_call_operand.vmem [shape: f32[84,10], index: 5, kind: input, shape index: {}]   ;;  %s604_s6 = inlined_call_operand.vmem [shape: f32[1,10], index: 6, kind: input, shape index: {}]   ;;  %s605_s7 = inlined_call_operand.hbm [shape: f32[2,10], index: 7, kind: output, shape index: {}]  }
   0x1   :  { %v75_v0 = vld [vmem:[%s599_s1 + $0x178] sm:$0xff]  ;;  %v74_v2 = vld [vmem:[%s599_s1 + $0x170] sm:$0xff]  ;;  %v73_v5 = vld [vmem:[%s599_s1 + $0x168] sm:$0xff] }
   0x2   :  { %v43_v1 = vld [vmem:[%s599_s1 + $0x78] sm:$0xff]  ;;  %134 = vmatpush.msra.mxu2 %v75_v0  ;;  %v42_v3 = vld [vmem:[%s599_s1 + $0x70] sm:$0xff]  ;;  %v41_v6 = vld [vmem:[%s599_s1 + $0x68] sm:$0xff] }
   0x3   :  { %94 = vmatpush.msra.mxu0 %v43_v1  ;;  %v59_v4 = vld [vmem:[%s599_s1 + $0xf8] sm:$0xff]  ;;  %v58_v7 = vld [vmem:[%s599_s1 + $0xf0] sm:$0xff]  ;;  %v57_v8 = vld [vmem:[%s599_s1 + $0xe8] sm:$0xff] }
   0x4   :  { %114 = vmatpush.msra.mxu1 %v59_v4  ;;  %135 = vmatpush.msra.mxu2 %v74_v2  ;;  %v72_v9 = vld [vmem:[%s599_s1 + $0x160] sm:$0xff]  ;;  %v71_v12 = vld [vmem:[%s599_s1 + $0x158] sm:$0xff]  ;;  %v70_v15 = vld [vmem:[%s599_s1 + $0x150] sm:$0xff] }
   0x5   :  { %95 = vmatpush.msra.mxu0 %v42_v3  ;;  %v40_v10 = vld [vmem:[%s599_s1 + $0x60] sm:$0xff]  ;;  %v39_v13 = vld [vmem:[%s599_s1 + $0x58] sm:$0xff]  ;;  %v38_v16 = vld [vmem:[%s599_s1 + $0x50] sm:$0xff] }
   0x6   :  { %115 = vmatpush.msra.mxu1 %v58_v7  ;;  %136 = vmatpush.msra.mxu2 %v73_v5  ;;  %v56_v11 = vld [vmem:[%s599_s1 + $0xe0] sm:$0xff]  ;;  %v55_v14 = vld [vmem:[%s599_s1 + $0xd8] sm:$0xff]  ;;  %v54_v17 = vld [vmem:[%s599_s1 + $0xd0] sm:$0xff] }
   0x7   :  { %96 = vmatpush.msra.mxu0 %v41_v6  ;;  %v69_v18 = vld [vmem:[%s599_s1 + $0x148] sm:$0xff]  ;;  %v68_v21 = vld [vmem:[%s599_s1 + $0x140] sm:$0xff]  ;;  %v67_v24 = vld [vmem:[%s599_s1 + $0x138] sm:$0xff] }
   0x8   :  { %116 = vmatpush.msra.mxu1 %v57_v8  ;;  %137 = vmatpush.msra.mxu2 %v72_v9  ;;  %v37_v19 = vld [vmem:[%s599_s1 + $0x48] sm:$0xff]  ;;  %v36_v22 = vld [vmem:[%s599_s1 + $0x40] sm:$0xff]  ;;  %v35_v25 = vld [vmem:[%s599_s1 + $0x38] sm:$0xff] }
   0x9   :  { %97 = vmatpush.msra.mxu0 %v40_v10  ;;  %v53_v20 = vld [vmem:[%s599_s1 + $0xc8] sm:$0xff]  ;;  %v52_v23 = vld [vmem:[%s599_s1 + $0xc0] sm:$0xff]  ;;  %v51_v26 = vld [vmem:[%s599_s1 + $0xb8] sm:$0xff] }
   0xa   :  { %117 = vmatpush.msra.mxu1 %v56_v11  ;;  %138 = vmatpush.msra.mxu2 %v71_v12  ;;  %v77_v27 = vld [vmem:[%s599_s1 + $0x188] sm:$0xff]  ;;  %v27_v28 = vld [vmem:[%s598_s0] sm:$0xff]  ;;  %v66_v29 = vld [vmem:[%s599_s1 + $0x130] sm:$0xff] }
   0xb   :  { %98 = vmatpush.msra.mxu0 %v39_v13  ;;  %v34_v30 = vld [vmem:[%s599_s1 + $0x30] sm:$0xff]  ;;  %168 = vmatpush.msra.mxu3 %v77_v27  ;;  %83 = vst [vmem:[#allocation1] ss:$4 sm:$0xff] %v27_v28  ;;  %v76_v31 = vld [vmem:[%s599_s1 + $0x180] sm:$0xff]  ;;  %v65_v34 = vld [vmem:[%s599_s1 + $0x128] sm:$0xff] }
   0xc   :  { %118 = vmatpush.msra.mxu1 %v55_v14  ;;  %139 = vmatpush.msra.mxu2 %v70_v15  ;;  %v50_v32 = vld [vmem:[%s599_s1 + $0xb0] sm:$0xff]  ;;  %v33_v35 = vld [vmem:[%s599_s1 + $0x28] sm:$0xff]  ;;  %v64_v36 = vld [vmem:[%s599_s1 + $0x120] sm:$0xff] }
   0xd   :  { %99 = vmatpush.msra.mxu0 %v38_v16  ;;  %v189_v33 = vld [vmem:[%s601_s3 + $0x70] sm:$0xff]  ;;  %169 = vmatpush.msra.mxu3 %v76_v31  ;;  %v32_v37 = vld [vmem:[%s599_s1 + $0x20] sm:$0xff]  ;;  %v49_v38 = vld [vmem:[%s599_s1 + $0xa8] sm:$0xff] }
   0xe   :  { %119 = vmatpush.msra.mxu1 %v54_v17  ;;  %140 = vmatpush.msra.mxu2 %v69_v18  ;;  %v188_v39 = vld [vmem:[%s601_s3 + $0x68] sm:$0xff]  ;;  %v48_v40 = vld [vmem:[%s599_s1 + $0xa0] sm:$0xff] }
   0xf   :  { %100 = vmatpush.msra.mxu0 %v37_v19  ;;  %199 = vmatpush.msrb.mxu3 %v189_v33  ;;  %v187_v41 = vld [vmem:[%s601_s3 + $0x60] sm:$0xff] }
  0x10   :  { %120 = vmatpush.msra.mxu1 %v53_v20  ;;  %141 = vmatpush.msra.mxu2 %v68_v21 }
  0x11   :  { %101 = vmatpush.msra.mxu0 %v36_v22 }
  0x12   :  { %121 = vmatpush.msra.mxu1 %v52_v23  ;;  %142 = vmatpush.msra.mxu2 %v67_v24 }
  0x13   :  { %102 = vmatpush.msra.mxu0 %v35_v25 }
  0x14   :  { %122 = vmatpush.msra.mxu1 %v51_v26  ;;  %143 = vmatpush.msra.mxu2 %v66_v29 }
  0x15   :  { %103 = vmatpush.msra.mxu0 %v34_v30 }
  0x16   :  { %123 = vmatpush.msra.mxu1 %v50_v32  ;;  %144 = vmatpush.msra.mxu2 %v65_v34 }
  0x17   :  { %104 = vmatpush.msra.mxu0 %v33_v35 }
  0x18   :  { %12 = vsyncpa [#allocation3], 0  ;;  %124 = vmatpush.msra.mxu1 %v49_v38  ;;  %v63_v42 = vld [vmem:[%s599_s1 + $0x118] sm:$0xff]  ;;  %200 = vmatpush.msrb.mxu3 %v188_v39  ;;  %vm91_vm0 = vcmask 130048   ;;  %v62_v45 = vld [vmem:[%s599_s1 + $0x110] sm:$0xff]  ;;  %vm238_vm1 = vcmask 1043456  }
  0x19   :  { %v31_v43 = vld [vmem:[%s599_s1 + $0x18] sm:$0xff]  ;;  %145 = vmatpush.msra.mxu2 %v64_v36  ;;  %105 = vmatpush.msra.mxu0 %v32_v37  ;;  %v30_v46 = vld [vmem:[%s599_s1 + $0x10] sm:$0xff]  ;;  %v61_v50 = vld [vmem:[%s599_s1 + $0x108] sm:$0xff]  ;;  %vm194_vm2 = vcmask 982016   ;;  %vm234_vm3 = vcmask 687104   ;;  %s314_s15 = smov [#allocation2]  }
  0x1a   :  { %v47_v44 = vld [vmem:[%s599_s1 + $0x98] sm:$0xff]  ;;  %125 = vmatpush.msra.mxu1 %v48_v40  ;;  %201 = vmatpush.msrb.mxu3 %v187_v41  ;;  %v46_v48 = vld [vmem:[%s599_s1 + $0x90] sm:$0xff]  ;;  %v29_v51 = vld [vmem:[%s599_s1 + $0x8] sm:$0xff]  ;;  %s269_s16 = sshll.u32 %s314_s15, 4  ;;  %vm262_vm4 = vcmask 74752   ;;  %s270_s16 = int_to_ptr.vmem [resolvable:$true] %s269_s16 }
  0x1b   :  { %v87_v47 = vld.sshfl [vmem:[#allocation1 + $0x18] sm:$0xff pattern:$0x73625140]  ;;  %146 = vmatpush.msra.mxu2 %v63_v42  ;;  %106 = vmatpush.msra.mxu0 %v31_v43  ;;  %v45_v52 = vld [vmem:[%s599_s1 + $0x88] sm:$0xff]  ;;  %v185_v53 = vld [vmem:[%s601_s3 + $0x50] sm:$0xff] }
  0x1c   :  { %v186_v49 = vld [vmem:[%s601_s3 + $0x58] sm:$0xff]  ;;  %126 = vmatpush.msra.mxu1 %v47_v44  ;;  %280 = vmatmul.msk.f32.vlgmr.msra.gmra.mxu3 %vm91_vm0, %v87_v47  ;;  %v60_v54 = vld [vmem:[%s599_s1 + $0x100] sm:$0xff]  ;;  %v86_v56 = vld.sshfl [vmem:[#allocation1 + $0x10] sm:$0xff pattern:$0x73625140] }
  0x1d   :  { %147 = vmatpush.msra.mxu2 %v62_v45  ;;  %107 = vmatpush.msra.mxu0 %v30_v46  ;;  %v28_v55 = vld [vmem:[%s599_s1] sm:$0xff]  ;;  %v184_v59 = vld [vmem:[%s601_s3 + $0x48] sm:$0xff]  ;;  %v182_v62 = vld [vmem:[%s601_s3 + $0x38] sm:$0xff] }
  0x1e   :  { %127 = vmatpush.msra.mxu1 %v46_v48  ;;  %202 = vmatpush.msrb.mxu3 %v186_v49  ;;  %v84_v57 = vld.sshfl [vmem:[#allocation1] sm:$0xff pattern:$0x73625140]  ;;  %v85_v60 = vld.sshfl [vmem:[#allocation1 + $0x8] sm:$0xff pattern:$0x73625140] }
  0x1f   :  { %148 = vmatpush.msra.mxu2 %v61_v50  ;;  %108 = vmatpush.msra.mxu0 %v29_v51  ;;  %v44_v58 = vld [vmem:[%s599_s1 + $0x80] sm:$0xff]  ;;  %v181_v63 = vld [vmem:[%s601_s3 + $0x30] sm:$0xff]  ;;  %v180_v0 = vld [vmem:[%s601_s3 + $0x28] sm:$0xff] }
  0x20   :  { %128 = vmatpush.msra.mxu1 %v45_v52  ;;  %203 = vmatpush.msrb.mxu3 %v185_v53  ;;  %v183_v61 = vld [vmem:[%s601_s3 + $0x40] sm:$0xff]  ;;  %v178_v2 = vld [vmem:[%s601_s3 + $0x18] sm:$0xff]  ;;  %v177_v3 = vld [vmem:[%s601_s3 + $0x10] sm:$0xff] }
  0x21   :  { %149 = vmatpush.msra.mxu2 %v60_v54  ;;  %109 = vmatpush.msra.mxu0 %v28_v55  ;;  %v179_v1 = vld [vmem:[%s601_s3 + $0x20] sm:$0xff]  ;;  %v176_v4 = vld [vmem:[%s601_s3 + $0x8] sm:$0xff]  ;;  %v229_v6 = vld [vmem:[%s603_s5 + $0x50] sm:$0xf] }
  0x22   :  { %150 = vmatmul.f32.vlgmr.msra.gmra.mxu2 %v86_v56  ;;  %110 = vmatmul.f32.vlgmr.msra.gmra.mxu0 %v84_v57  ;;  %v175_v5 = vld [vmem:[%s601_s3] sm:$0xff]  ;;  %v228_v7 = vld [vmem:[%s603_s5 + $0x48] sm:$0xff]  ;;  %v226_v9 = vld [vmem:[%s603_s5 + $0x38] sm:$0xff] }
  0x23   :  { %129 = vmatpush.msra.mxu1 %v44_v58  ;;  %204 = vmatpush.msrb.mxu3 %v184_v59  ;;  %v227_v8 = vld [vmem:[%s603_s5 + $0x40] sm:$0xff]  ;;  %v225_v10 = vld [vmem:[%s603_s5 + $0x30] sm:$0xff]  ;;  %v224_v11 = vld [vmem:[%s603_s5 + $0x28] sm:$0xff] }
  0x24   :  { %130 = vmatmul.f32.vlgmr.msra.gmra.mxu1 %v85_v60  ;;  %282 = vmatpush.msk.msrb.mxu0 %vm238_vm1, %v229_v6  ;;  %v223_v12 = vld [vmem:[%s603_s5 + $0x20] sm:$0xff]  ;;  %v222_v13 = vld [vmem:[%s603_s5 + $0x18] sm:$0xff]  ;;  %v221_v24 = vld [vmem:[%s603_s5 + $0x10] sm:$0xff] }
  0x25   :  { %205 = vmatpush.msrb.mxu3 %v183_v61  ;;  %v285_v14 = vld [vmem:[%s600_s2] ss:$0 sm:$0xff]  ;;  %v220_v25 = vld [vmem:[%s603_s5 + $0x8] sm:$0xff] }
  0x26   :  { %248 = vmatpush.msrb.mxu0 %v228_v7  ;;  %v219_v26 = vld [vmem:[%s603_s5] sm:$0xff]  ;;  %s271_s5 = sshll.u32 %s605_s7, 4  ;;  %s272_s5 = int_to_ptr.hbm [resolvable:$true] %s271_s5 }
  0x27   :  { %206 = vmatpush.msrb.mxu3 %v182_v62  ;;  %v286_v27 = vld [vmem:[%s602_s4] ss:$0 sm:$0xff] }
  0x28   :  { %249 = vmatpush.msrb.mxu0 %v227_v8  ;;  %v287_v31 = vld [vmem:[%s604_s6] ss:$0 sm:$0xff] }
  0x29   :  { %207 = vmatpush.msrb.mxu3 %v181_v63 }
  0x2a   :  { %250 = vmatpush.msrb.mxu0 %v226_v9 }
  0x2b   :  { %208 = vmatpush.msrb.mxu3 %v180_v0 }
  0x2c   :  { %251 = vmatpush.msrb.mxu0 %v225_v10 }
  0x2d   :  { %209 = vmatpush.msrb.mxu3 %v179_v1 }
  0x2e   :  { %252 = vmatpush.msrb.mxu0 %v224_v11 }
  0x2f   :  { %210 = vmatpush.msrb.mxu3 %v178_v2 }
  0x30   :  { %253 = vmatpush.msrb.mxu0 %v223_v12 }
  0x31   :  { %211 = vmatpush.msrb.mxu3 %v177_v3 }
  0x32   :  { %254 = vmatpush.msrb.mxu0 %v222_v13 }
  0x33   :  { %212 = vmatpush.msrb.mxu3 %v176_v4 }
  0x34   :  { %255 = vmatpush.msrb.mxu0 %v221_v24 }
  0x35   :  { %213 = vmatpush.msrb.mxu3 %v175_v5 }
  0x36   :  { %256 = vmatpush.msrb.mxu0 %v220_v25 }
  0x38   :  { %257 = vmatpush.msrb.mxu0 %v219_v26 }
  0x9f   :  { %v111_v15 = vpop.f32.mrf.mxu0  ;;  %v171_v20 = vpop.f32.mrf.mxu3 }
  0xa0   :  { %v112_v16 = vadd.f32 %v285_v14, %v111_v15 }
  0xa1   :  { %v131_v17 = vpop.f32.mrf.mxu1 }
  0xa2   :  { %v132_v18 = vadd.f32 %v131_v17, %v112_v16 }
  0xa5   :  { %v151_v19 = vpop.f32.mrf.mxu2 }
  0xa6   :  { %v152_v21 = vadd.f32 %v151_v19, %v132_v18 }
  0xa8   :  { %v172_v22 = vadd.f32 %v171_v20, %v152_v21 }
  0xaa   :  { %v174_v23 = vmax.f32 %v172_v22, 0.0 }
  0xac   :  { %281 = vmatmul.msk.f32.vlgmr.msrb.gmra.mxu3 %vm194_vm2, %v174_v23 }
 0x12f   :  { %v215_v28 = vpop.f32.mrf.mxu3 }
 0x130   :  { %v216_v29 = vadd.f32 %v286_v27, %v215_v28 }
 0x132   :  { %v218_v30 = vmax.f32 %v216_v29, 0.0 }
 0x134   :  { %283 = vmatmul.msk.f32.vlgmr.msrb.gmra.mxu0 %vm234_vm3, %v218_v30 }
 0x1b1   :  { %v259_v32 = vpop.f32.mrf.mxu0 }
 0x1b2   :  { %v260_v33 = vadd.f32 %v287_v31, %v259_v32 }
 0x1b4   :  { %263 = vst.msk [vmem:[#allocation2] sm:$0x3] %vm262_vm4, %v260_v33 }
 0x1b5   :  { %274 = dma.vmem_to_hbm [thread:$0]  %s270_s16, 32, %s272_s5, [#allocation3]  }
 0x1b6   :  { %312 = dma.done.wait [#allocation3], 32  }
 0x1b7   :  { %313 = vsyncadd [#allocation3], 4294967264 }
 0x1b8   :  { %279 = vsyncpa [#allocation3], 1 }

</bundles_post_ra>
